<compile_context>
chip_gen: v5e
topology: v5e:2x2
jax: 0.10.0
libtpu: 0.0.40
codegen_flags: <defaults>
</compile_context>

<pallas_src>
import functools

import jax
import jax.numpy as jnp
from jax.experimental import pallas as pl
from jax.experimental.pallas import tpu as pltpu

TAU = 2.0
V_TH = 1.0
THRESH = TAU * V_TH    # x/tau >= v_th  <=>  x >= tau*v_th (exact: both powers of two)


def _spike(v, dtype):
    # single-step LIF (tau=2, v_th=1, v_reset=0, decay_input=True) from v=0.
    return (v >= THRESH).astype(dtype)


def mixer_block_kernel(x_ref,
                       w1t_ref, w2t_ref, w1c_ref, w2c_ref,
                       b1t_ref, b2t_ref,
                       ts_s_ref, ts_h_ref, t1_s_ref, t1_h_ref,
                       t2_s_ref, t2_h_ref,
                       cs_s_ref, cs_h_ref, c1_s_ref, c1_h_ref,
                       c2_s_ref, c2_h_ref,
                       o_ref, xT_ref, y_ref, *, tb, p_pad, e_dim):
    P, E = p_pad, e_dim
    f32, bf16 = jnp.float32, jnp.bfloat16

    # ---- stage the batch tile into the token-mixing layout [P, TB*E] --------
    # (per-sample lane-block copies inside VMEM: x is read from HBM once and no
    #  wrapper-side transpose / extra HBM pass is needed)
    for t in range(tb):
        xT_ref[:, t * E:(t + 1) * E] = x_ref[t]
    xT = xT_ref[...]                                            # [P, TB*E] f32

    # ---------- token-mixing MLP: two batched MXU matmuls over TB*E ----------
    skip_t = xT * ts_s_ref[...] + ts_h_ref[...]                 # [P, TB*E]
    h1 = jnp.dot(w1t_ref[...], xT.astype(bf16),
                 preferred_element_type=f32)                    # [Ht, TB*E]
    s1 = _spike((h1 + b1t_ref[...]) * t1_s_ref[...] + t1_h_ref[...], bf16)
    h2 = jnp.dot(w2t_ref[...], s1, preferred_element_type=f32)  # [P, TB*E]
    yb = _spike((h2 + b2t_ref[...]) * t2_s_ref[...] + t2_h_ref[...] + skip_t,
                bf16)                                           # token spikes

    # ---- regroup spikes per sample into [TB*P, E] for the channel matmuls ---
    for t in range(tb):
        y_ref[t * P:(t + 1) * P, :] = yb[:, t * E:(t + 1) * E]
    y2 = y_ref[...]                                             # [TB*P, E] bf16
    y3 = y2.reshape(tb, P, E)                                   # free leading split

    # -------------- channel-mixing MLP: two batched MXU matmuls --------------
    skip_c = y3 * cs_s_ref[...][None] + cs_h_ref[...][None]     # [TB, P, E] f32
    z1 = jnp.dot(y2, w1c_ref[...], preferred_element_type=f32)  # [TB*P, Hc]
    t1 = _spike(z1.reshape(tb, P, -1) * c1_s_ref[...][None]
                + c1_h_ref[...][None], bf16)                    # [TB, P, Hc]
    z2 = jnp.dot(t1.reshape(tb * P, -1), w2c_ref[...],
                 preferred_element_type=f32)                    # [TB*P, E]
    o_ref[...] = _spike(z2.reshape(tb, P, E) * c2_s_ref[...][None]
                        + c2_h_ref[...][None] + skip_c, f32)


# --------------------------- tiling / hardware glue ---------------------------
def _hardware():
    """Best-effort (VMEM capacity, TensorCore count); conservative fallbacks."""
    vmem_cap, n_cores = 64 << 20, 1            # v7x-sized conservative defaults
    try:
        info = pltpu.get_tpu_info()
        vmem_cap = int(getattr(info, "vmem_capacity_bytes", vmem_cap))
        for name in ("num_cores", "core_count", "num_tensorcores",
                     "tensorcore_count", "cores_per_chip"):
            v = getattr(info, name, None)
            if v:
                n_cores = int(v)
                break
    except Exception:
        pass
    return vmem_cap, n_cores


def _pick_batch_tile(B, Ppad, E, Ht, Hc, vmem_cap, n_cores):
    """Largest batch tile whose per-grid-step VMEM footprint fits the budget."""
    # Rough per-sample bytes of one grid step:
    #   x + out blocks (f32, double-buffered) .......... 16 * Ppad*E
    #   xT (f32) + y (bf16) staging scratch ............  6 * Ppad*E
    #   token/channel f32+bf16 intermediates ........... 22 * Ppad*E
    #   token hidden (h1 f32 + s1 bf16) ................  6 * Ht*E
    #   channel hidden (z1 f32 + t1 bf16) ..............  6 * Ppad*Hc
    per_sample = 44 * Ppad * E + 6 * Ht * E + 6 * Ppad * Hc
    budget = (2 * vmem_cap) // 5               # ~40% of VMEM for tile-scaled state
    tb = max(1, min(B, budget // max(1, per_sample), 64))
    while B % tb:
        tb -= 1
    # Megacore: give the "parallel" grid axis >= 2 steps only when the chip has
    # more than one TensorCore and splitting keeps a healthy channel-matmul M.
    if n_cores > 1 and tb == B and B % 2 == 0 and (B // 2) * Ppad >= 128:
        tb = B // 2
    return tb


def mixer_block(x, p, *, batch_tile=None):
    B, P, E = x.shape
    Ht = p["W1t"].shape[0]
    Hc = p["W1c"].shape[0]
    f32, bf16 = jnp.float32, jnp.bfloat16

    x = x.astype(f32)

    # --- pad n_patches to a sublane multiple (padded rows dropped at the end) ---
    Ppad = ((P + 7) // 8) * 8
    pad = Ppad - P
    W1t, W2t, b2t = p["W1t"], p["W2t"], p["b2t"]
    sCsk, hCsk = p["bnC_skip"]
    sC1, hC1 = p["bnC1"]
    sC2, hC2 = p["bnC2"]
    if pad:
        x = jnp.pad(x, ((0, 0), (0, pad), (0, 0)))
        W1t = jnp.pad(W1t, ((0, 0), (0, pad)))     # zero columns: matmul stays exact
        W2t = jnp.pad(W2t, ((0, pad), (0, 0)))     # zero rows: junk rows get dropped
        b2t = jnp.pad(b2t, (0, pad))
        pad_s = lambda v: jnp.pad(v, (0, pad), constant_values=1.0)
        pad_h = lambda v: jnp.pad(v, (0, pad))
        sCsk, hCsk = pad_s(sCsk), pad_h(hCsk)
        sC1, hC1 = pad_s(sC1), pad_h(hC1)
        sC2, hC2 = pad_s(sC2), pad_h(hC2)

    vmem_cap, n_cores = _hardware()
    TB = (_pick_batch_tile(B, Ppad, E, Ht, Hc, vmem_cap, n_cores)
          if batch_tile is None else batch_tile)
    assert B % TB == 0
    G = B // TB

    # ---- parameters: bf16 weight tiles + f32 folded BN / bias operands ------
    w1t = W1t.astype(bf16)                          # [Ht, Ppad]
    w2t = W2t.astype(bf16)                          # [Ppad, Ht]
    w1c = p["W1c"].T.astype(bf16)                   # [E, Hc]
    w2c = p["W2c"].T.astype(bf16)                   # [Hc, E]
    b1t = p["b1t"].astype(f32)[:, None]             # [Ht, 1]   per-row bias
    b2tc = b2t.astype(f32)[:, None]                 # [Ppad, 1] per-row bias

    def erow(v):    # per-encode-dim vector -> [1, TB*E] (one E block per sample)
        return jnp.tile(v.astype(f32), (TB,))[None, :]

    sTsk, hTsk = p["bnT_skip"]
    sT1, hT1 = p["bnT1"]
    sT2, hT2 = p["bnT2"]
    ts_s, ts_h = erow(sTsk), erow(hTsk)
    t1_s, t1_h = erow(sT1), erow(hT1)
    t2_s, t2_h = erow(sT2), erow(hT2)

    # Channel path: BN per patch (rows), Linear bias per feature (cols) ->
    # genuinely rank-2 [Ppad, E] / [Ppad, Hc] operands (bias folds done in f32).
    cs_s = jnp.broadcast_to(sCsk.astype(f32)[:, None], (Ppad, E))
    cs_h = jnp.broadcast_to(hCsk.astype(f32)[:, None], (Ppad, E))
    c1_s = jnp.broadcast_to(sC1.astype(f32)[:, None], (Ppad, Hc))
    c1_h = (sC1[:, None] * p["b1c"][None, :] + hC1[:, None]).astype(f32)
    c2_s = jnp.broadcast_to(sC2.astype(f32)[:, None], (Ppad, E))
    c2_h = (sC2[:, None] * p["b2c"][None, :] + hC2[:, None]).astype(f32)

    consts = (w1t, w2t, w1c, w2c, b1t, b2tc,
              ts_s, ts_h, t1_s, t1_h, t2_s, t2_h,
              cs_s, cs_h, c1_s, c1_h, c2_s, c2_h)

    kernel = functools.partial(mixer_block_kernel, tb=TB, p_pad=Ppad, e_dim=E)
    vmem_limit = min(int(vmem_cap * 0.9), 128 * 1024 * 1024)

    def call(single_buffer_consts):
        def fixed(shape):
            kw = ({"pipeline_mode": pl.Buffered(1)} if single_buffer_consts else {})
            return pl.BlockSpec(shape, lambda g: (0,) * len(shape), **kw)

        return pl.pallas_call(
            kernel,
            out_shape=jax.ShapeDtypeStruct((B, Ppad, E), f32),
            grid=(G,),
            in_specs=[pl.BlockSpec((TB, Ppad, E), lambda g: (g, 0, 0))]
                     + [fixed(c.shape) for c in consts],
            out_specs=pl.BlockSpec((TB, Ppad, E), lambda g: (g, 0, 0)),
            scratch_shapes=[pltpu.VMEM((Ppad, TB * E), f32),     # staged x^T tile
                            pltpu.VMEM((TB * Ppad, E), bf16)],   # token-path spikes
            compiler_params=pltpu.CompilerParams(
                dimension_semantics=("parallel",),
                vmem_limit_bytes=vmem_limit),
        )(x, *consts)

    try:
        out = jax.block_until_ready(call(single_buffer_consts=True))
    except Exception:
        # This jax version rejected pl.Buffered(1) single-buffering of the
        # grid-invariant operands; fall back to the default 2-deep pipeline.
        out = call(single_buffer_consts=False)

    return out[:, :P, :] if pad else out


# ------------------------- deterministic parameter init -------------------------
def _fold_bn(gamma, beta, mean, var, eps=1e-5):
    scale = gamma / jnp.sqrt(var + eps)
    shift = beta - mean * scale
    return scale, shift


def _linear_init(key, out_dim, in_dim):
    kw, kb = jax.random.split(key)
    bound = 1.0 / jnp.sqrt(in_dim)
    W = jax.random.uniform(kw, (out_dim, in_dim), jnp.float32, -bound, bound)
    b = jax.random.uniform(kb, (out_dim,), jnp.float32, -bound, bound)
    return W, b


def _bn_init(key, n):
    k1, k2, k3, k4 = jax.random.split(key, 4)
    gamma = jax.random.uniform(k1, (n,), jnp.float32, 0.5, 1.5)
    beta = 0.1 * jax.random.normal(k2, (n,), jnp.float32)
    mean = 0.1 * jax.random.normal(k3, (n,), jnp.float32)
    var = jax.random.uniform(k4, (n,), jnp.float32, 0.5, 1.5)
    return _fold_bn(gamma, beta, mean, var)


def init_params(key, P, E, Ht, Hc):
    ks = jax.random.split(key, 10)
    W1t, b1t = _linear_init(ks[0], Ht, P)     # token Linear(n_patches -> token_hidden)
    W2t, b2t = _linear_init(ks[1], P, Ht)     # token Linear(token_hidden -> n_patches)
    W1c, b1c = _linear_init(ks[2], Hc, E)     # channel Linear(encode_dim -> channel_hidden)
    W2c, b2c = _linear_init(ks[3], E, Hc)     # channel Linear(channel_hidden -> encode_dim)
    return dict(
        W1t=W1t, b1t=b1t, W2t=W2t, b2t=b2t,
        W1c=W1c, b1c=b1c, W2c=W2c, b2c=b2c,
        bnT_skip=_bn_init(ks[4], E), bnT1=_bn_init(ks[5], E), bnT2=_bn_init(ks[6], E),
        bnC_skip=_bn_init(ks[7], P), bnC1=_bn_init(ks[8], P), bnC2=_bn_init(ks[9], P),
    )


# ------------------------------ plain-JAX reference ------------------------------
def _mlp_block_ref(x, W1, b1, W2, b2, bn_skip, bn1, bn2):
    # x: [B, C, D]; BatchNorm1d normalizes over C (dim 1), eval-mode folded.
    # Matmul operands cast to bf16 / accumulate in f32 to mirror the kernel.
    bf16 = jnp.bfloat16

    def bn(v, pr):
        s, sh = pr
        return v * s[None, :, None] + sh[None, :, None]

    h = bn(x, bn_skip)
    y = jnp.einsum("bcd,hd->bch", x.astype(bf16), W1.astype(bf16),
                   preferred_element_type=jnp.float32) + b1[None, None, :]
    y = bn(y, bn1)
    y = (y / TAU >= V_TH).astype(jnp.float32)
    y = jnp.einsum("bch,dh->bcd", y.astype(bf16), W2.astype(bf16),
                   preferred_element_type=jnp.float32) + b2[None, None, :]
    y = bn(y, bn2)
    return ((y + h) / TAU >= V_TH).astype(jnp.float32)


def mixer_ref(x, p):
    xt = jnp.swapaxes(x, -1, -2)                         # [B, E, P]
    xt = _mlp_block_ref(xt, p["W1t"], p["b1t"], p["W2t"], p["b2t"],
                        p["bnT_skip"], p["bnT1"], p["bnT2"])
    y = jnp.swapaxes(xt, -1, -2)                         # [B, P, E]
    return _mlp_block_ref(y, p["W1c"], p["b1c"], p["W2c"], p["b2c"],
                          p["bnC_skip"], p["bnC1"], p["bnC2"])


if __name__ == "__main__":
    def run_case(B, P, E, Ht, Hc, key):
        kx, kp = jax.random.split(key)
        x = 2.0 * jax.random.normal(kx, (B, P, E), jnp.float32)
        params = init_params(kp, P, E, Ht, Hc)
        out = jax.block_until_ready(mixer_block(x, params))
        ref = jax.block_until_ready(mixer_ref(x, params))
        assert out.shape == (B, P, E) and out.dtype == jnp.float32
        # Outputs are binary spikes; allow a tiny mismatch budget for fp rounding
        # exactly at the spike threshold (different f32 fold orders).
        mismatch = float(jnp.mean(jnp.abs(out - ref)))
        assert mismatch <= 0.02, f"spike mismatch fraction too large: {mismatch}"

    k1, k2 = jax.random.split(jax.random.PRNGKey(0))
    run_case(B=2, P=8, E=32, Ht=16, Hc=32, key=k1)   # aligned n_patches
    run_case(B=2, P=6, E=32, Ht=16, Hc=32, key=k2)   # n_patches padded 6 -> 8

    print("KERNEL_OK")
</pallas_src>

<mosaic_0001>
module attributes {stable_mosaic.version = 11 : i64} {
  func.func @mixer_block_kernel(%arg0: i32, %arg1: memref<2x8x32xf32, #tpu.memory_space<vmem>>, %arg2: memref<16x8xbf16, #tpu.memory_space<vmem>>, %arg3: memref<8x16xbf16, #tpu.memory_space<vmem>>, %arg4: memref<32x32xbf16, #tpu.memory_space<vmem>>, %arg5: memref<32x32xbf16, #tpu.memory_space<vmem>>, %arg6: memref<16x1xf32, #tpu.memory_space<vmem>>, %arg7: memref<8x1xf32, #tpu.memory_space<vmem>>, %arg8: memref<1x64xf32, #tpu.memory_space<vmem>>, %arg9: memref<1x64xf32, #tpu.memory_space<vmem>>, %arg10: memref<1x64xf32, #tpu.memory_space<vmem>>, %arg11: memref<1x64xf32, #tpu.memory_space<vmem>>, %arg12: memref<1x64xf32, #tpu.memory_space<vmem>>, %arg13: memref<1x64xf32, #tpu.memory_space<vmem>>, %arg14: memref<8x32xf32, #tpu.memory_space<vmem>>, %arg15: memref<8x32xf32, #tpu.memory_space<vmem>>, %arg16: memref<8x32xf32, #tpu.memory_space<vmem>>, %arg17: memref<8x32xf32, #tpu.memory_space<vmem>>, %arg18: memref<8x32xf32, #tpu.memory_space<vmem>>, %arg19: memref<8x32xf32, #tpu.memory_space<vmem>>, %arg20: memref<2x8x32xf32, #tpu.memory_space<vmem>>, %arg21: memref<8x64xf32, #tpu.memory_space<vmem>>, %arg22: memref<16x32xbf16, #tpu.memory_space<vmem>>) attributes {dimension_semantics = [#tpu.dimension_semantics<parallel>], iteration_bounds = array<i64: 1>, scalar_prefetch = 0 : i64, scratch_operands = 2 : i64, tpu.core_type = #tpu.core_type<tc>, window_params = [{transform_indices = @transform_0, window_bounds = array<i64: 2, 8, 32>}, {pipeline_mode = #tpu.pipeline_mode<synchronous>, transform_indices = @transform_1, window_bounds = array<i64: 16, 8>}, {pipeline_mode = #tpu.pipeline_mode<synchronous>, transform_indices = @transform_2, window_bounds = array<i64: 8, 16>}, {pipeline_mode = #tpu.pipeline_mode<synchronous>, transform_indices = @transform_3, window_bounds = array<i64: 32, 32>}, {pipeline_mode = #tpu.pipeline_mode<synchronous>, transform_indices = @transform_4, window_bounds = array<i64: 32, 32>}, {pipeline_mode = #tpu.pipeline_mode<synchronous>, transform_indices = @transform_5, window_bounds = array<i64: 16, 1>}, {pipeline_mode = #tpu.pipeline_mode<synchronous>, transform_indices = @transform_6, window_bounds = array<i64: 8, 1>}, {pipeline_mode = #tpu.pipeline_mode<synchronous>, transform_indices = @transform_7, window_bounds = array<i64: 1, 64>}, {pipeline_mode = #tpu.pipeline_mode<synchronous>, transform_indices = @transform_8, window_bounds = array<i64: 1, 64>}, {pipeline_mode = #tpu.pipeline_mode<synchronous>, transform_indices = @transform_9, window_bounds = array<i64: 1, 64>}, {pipeline_mode = #tpu.pipeline_mode<synchronous>, transform_indices = @transform_10, window_bounds = array<i64: 1, 64>}, {pipeline_mode = #tpu.pipeline_mode<synchronous>, transform_indices = @transform_11, window_bounds = array<i64: 1, 64>}, {pipeline_mode = #tpu.pipeline_mode<synchronous>, transform_indices = @transform_12, window_bounds = array<i64: 1, 64>}, {pipeline_mode = #tpu.pipeline_mode<synchronous>, transform_indices = @transform_13, window_bounds = array<i64: 8, 32>}, {pipeline_mode = #tpu.pipeline_mode<synchronous>, transform_indices = @transform_14, window_bounds = array<i64: 8, 32>}, {pipeline_mode = #tpu.pipeline_mode<synchronous>, transform_indices = @transform_15, window_bounds = array<i64: 8, 32>}, {pipeline_mode = #tpu.pipeline_mode<synchronous>, transform_indices = @transform_16, window_bounds = array<i64: 8, 32>}, {pipeline_mode = #tpu.pipeline_mode<synchronous>, transform_indices = @transform_17, window_bounds = array<i64: 8, 32>}, {pipeline_mode = #tpu.pipeline_mode<synchronous>, transform_indices = @transform_18, window_bounds = array<i64: 8, 32>}, {transform_indices = @transform_19, window_bounds = array<i64: 2, 8, 32>}]} {
    %c0 = arith.constant 0 : index
    %c0_0 = arith.constant 0 : index
    %c0_1 = arith.constant 0 : index
    %0 = vector.load %arg1[%c0, %c0_0, %c0_1] : memref<2x8x32xf32, #tpu.memory_space<vmem>>, vector<1x8x32xf32>
    %1 = vector.shape_cast %0 : vector<1x8x32xf32> to vector<8x32xf32>
    %c0_2 = arith.constant 0 : index
    %c0_3 = arith.constant 0 : index
    %2 = vector.load %arg21[%c0_2, %c0_3] : memref<8x64xf32, #tpu.memory_space<vmem>>, vector<8x32xf32>
    tpu.vector_store %arg21[%c0_2, %c0_3], %1 {strides = array<i32>} : memref<8x64xf32, #tpu.memory_space<vmem>>, vector<8x32xf32>,
    %c1 = arith.constant 1 : index
    %c0_4 = arith.constant 0 : index
    %c0_5 = arith.constant 0 : index
    %3 = vector.load %arg1[%c1, %c0_4, %c0_5] : memref<2x8x32xf32, #tpu.memory_space<vmem>>, vector<1x8x32xf32>
    %4 = vector.shape_cast %3 : vector<1x8x32xf32> to vector<8x32xf32>
    %c0_6 = arith.constant 0 : index
    %c32 = arith.constant 32 : index
    %5 = vector.load %arg21[%c0_6, %c32] : memref<8x64xf32, #tpu.memory_space<vmem>>, vector<8x32xf32>
    tpu.vector_store %arg21[%c0_6, %c32], %4 {strides = array<i32>} : memref<8x64xf32, #tpu.memory_space<vmem>>, vector<8x32xf32>,
    %c0_7 = arith.constant 0 : index
    %c0_8 = arith.constant 0 : index
    %6 = vector.load %arg21[%c0_7, %c0_8] : memref<8x64xf32, #tpu.memory_space<vmem>>, vector<8x64xf32>
    %c0_9 = arith.constant 0 : index
    %c0_10 = arith.constant 0 : index
    %7 = vector.load %arg8[%c0_9, %c0_10] : memref<1x64xf32, #tpu.memory_space<vmem>>, vector<1x64xf32>
    %8 = vector.broadcast %7 : vector<1x64xf32> to vector<8x64xf32>
    %9 = arith.mulf %6, %8 : vector<8x64xf32>
    %c0_11 = arith.constant 0 : index
    %c0_12 = arith.constant 0 : index
    %10 = vector.load %arg9[%c0_11, %c0_12] : memref<1x64xf32, #tpu.memory_space<vmem>>, vector<1x64xf32>
    %11 = vector.broadcast %10 : vector<1x64xf32> to vector<8x64xf32>
    %12 = arith.addf %9, %11 : vector<8x64xf32>
    %c0_13 = arith.constant 0 : index
    %c0_14 = arith.constant 0 : index
    %13 = vector.load %arg2[%c0_13, %c0_14] : memref<16x8xbf16, #tpu.memory_space<vmem>>, vector<16x8xbf16>
    %14 = arith.truncf %6 : vector<8x64xf32> to vector<8x64xbf16>
    %cst = arith.constant dense<0.000000e+00> : vector<16x64xf32>
    %15 = tpu.matmul %13, %14, %cst {dimension_numbers = #tpu.dot_dimension_numbers<[1], [0], [0], [1], [0, 0, 1, 1], [], []>} : vector<16x8xbf16>, vector<8x64xbf16>, vector<16x64xf32> -> vector<16x64xf32>
    %c0_15 = arith.constant 0 : index
    %c0_16 = arith.constant 0 : index
    %16 = vector.load %arg6[%c0_15, %c0_16] : memref<16x1xf32, #tpu.memory_space<vmem>>, vector<16x1xf32>
    %17 = vector.broadcast %16 : vector<16x1xf32> to vector<16x64xf32>
    %18 = arith.addf %15, %17 : vector<16x64xf32>
    %c0_17 = arith.constant 0 : index
    %c0_18 = arith.constant 0 : index
    %19 = vector.load %arg10[%c0_17, %c0_18] : memref<1x64xf32, #tpu.memory_space<vmem>>, vector<1x64xf32>
    %20 = vector.broadcast %19 : vector<1x64xf32> to vector<16x64xf32>
    %21 = arith.mulf %18, %20 : vector<16x64xf32>
    %c0_19 = arith.constant 0 : index
    %c0_20 = arith.constant 0 : index
    %22 = vector.load %arg11[%c0_19, %c0_20] : memref<1x64xf32, #tpu.memory_space<vmem>>, vector<1x64xf32>
    %23 = vector.broadcast %22 : vector<1x64xf32> to vector<16x64xf32>
    %24 = arith.addf %21, %23 : vector<16x64xf32>
    %cst_21 = arith.constant 2.000000e+00 : f32
    %25 = vector.broadcast %cst_21 : f32 to vector<16x64xf32>
    %26 = arith.cmpf oge, %24, %25 : vector<16x64xf32>
    %27 = arith.extui %26 : vector<16x64xi1> to vector<16x64xi32>
    %28 = arith.sitofp %27 : vector<16x64xi32> to vector<16x64xf32>
    %29 = arith.truncf %28 : vector<16x64xf32> to vector<16x64xbf16>
    %c0_22 = arith.constant 0 : index
    %c0_23 = arith.constant 0 : index
    %30 = vector.load %arg3[%c0_22, %c0_23] : memref<8x16xbf16, #tpu.memory_space<vmem>>, vector<8x16xbf16>
    %cst_24 = arith.constant dense<0.000000e+00> : vector<8x64xf32>
    %31 = tpu.matmul %30, %29, %cst_24 {dimension_numbers = #tpu.dot_dimension_numbers<[1], [0], [0], [1], [0, 0, 1, 1], [], []>} : vector<8x16xbf16>, vector<16x64xbf16>, vector<8x64xf32> -> vector<8x64xf32>
    %c0_25 = arith.constant 0 : index
    %c0_26 = arith.constant 0 : index
    %32 = vector.load %arg7[%c0_25, %c0_26] : memref<8x1xf32, #tpu.memory_space<vmem>>, vector<8x1xf32>
    %33 = vector.broadcast %32 : vector<8x1xf32> to vector<8x64xf32>
    %34 = arith.addf %31, %33 : vector<8x64xf32>
    %c0_27 = arith.constant 0 : index
    %c0_28 = arith.constant 0 : index
    %35 = vector.load %arg12[%c0_27, %c0_28] : memref<1x64xf32, #tpu.memory_space<vmem>>, vector<1x64xf32>
    %36 = vector.broadcast %35 : vector<1x64xf32> to vector<8x64xf32>
    %37 = arith.mulf %34, %36 : vector<8x64xf32>
    %c0_29 = arith.constant 0 : index
    %c0_30 = arith.constant 0 : index
    %38 = vector.load %arg13[%c0_29, %c0_30] : memref<1x64xf32, #tpu.memory_space<vmem>>, vector<1x64xf32>
    %39 = vector.broadcast %38 : vector<1x64xf32> to vector<8x64xf32>
    %40 = arith.addf %37, %39 : vector<8x64xf32>
    %41 = arith.addf %40, %12 : vector<8x64xf32>
    %cst_31 = arith.constant 2.000000e+00 : f32
    %42 = vector.broadcast %cst_31 : f32 to vector<8x64xf32>
    %43 = arith.cmpf oge, %41, %42 : vector<8x64xf32>
    %44 = arith.extui %43 : vector<8x64xi1> to vector<8x64xi32>
    %45 = arith.sitofp %44 : vector<8x64xi32> to vector<8x64xf32>
    %46 = arith.truncf %45 : vector<8x64xf32> to vector<8x64xbf16>
    %47 = vector.extract_strided_slice %46 {offsets = [0, 0], sizes = [8, 32], strides = [1, 1]} : vector<8x64xbf16> to vector<8x32xbf16>
    %c0_32 = arith.constant 0 : index
    %c0_33 = arith.constant 0 : index
    %48 = vector.load %arg22[%c0_32, %c0_33] : memref<16x32xbf16, #tpu.memory_space<vmem>>, vector<8x32xbf16>
    tpu.vector_store %arg22[%c0_32, %c0_33], %47 {strides = array<i32>} : memref<16x32xbf16, #tpu.memory_space<vmem>>, vector<8x32xbf16>,
    %49 = vector.extract_strided_slice %46 {offsets = [0, 32], sizes = [8, 32], strides = [1, 1]} : vector<8x64xbf16> to vector<8x32xbf16>
    %c8 = arith.constant 8 : index
    %c0_34 = arith.constant 0 : index
    %50 = vector.load %arg22[%c8, %c0_34] : memref<16x32xbf16, #tpu.memory_space<vmem>>, vector<8x32xbf16>
    tpu.vector_store %arg22[%c8, %c0_34], %49 {strides = array<i32>} : memref<16x32xbf16, #tpu.memory_space<vmem>>, vector<8x32xbf16>,
    %c0_35 = arith.constant 0 : index
    %c0_36 = arith.constant 0 : index
    %51 = vector.load %arg22[%c0_35, %c0_36] : memref<16x32xbf16, #tpu.memory_space<vmem>>, vector<16x32xbf16>
    %52 = vector.shape_cast %51 : vector<16x32xbf16> to vector<2x8x32xbf16>
    %c0_37 = arith.constant 0 : index
    %c0_38 = arith.constant 0 : index
    %53 = vector.load %arg14[%c0_37, %c0_38] : memref<8x32xf32, #tpu.memory_space<vmem>>, vector<8x32xf32>
    %54 = vector.shape_cast %53 : vector<8x32xf32> to vector<1x8x32xf32>
    %55 = arith.extf %52 : vector<2x8x32xbf16> to vector<2x8x32xf32>
    %56 = vector.broadcast %54 : vector<1x8x32xf32> to vector<2x8x32xf32>
    %57 = arith.mulf %55, %56 : vector<2x8x32xf32>
    %c0_39 = arith.constant 0 : index
    %c0_40 = arith.constant 0 : index
    %58 = vector.load %arg15[%c0_39, %c0_40] : memref<8x32xf32, #tpu.memory_space<vmem>>, vector<8x32xf32>
    %59 = vector.shape_cast %58 : vector<8x32xf32> to vector<1x8x32xf32>
    %60 = vector.broadcast %59 : vector<1x8x32xf32> to vector<2x8x32xf32>
    %61 = arith.addf %57, %60 : vector<2x8x32xf32>
    %c0_41 = arith.constant 0 : index
    %c0_42 = arith.constant 0 : index
    %62 = vector.load %arg4[%c0_41, %c0_42] : memref<32x32xbf16, #tpu.memory_space<vmem>>, vector<32x32xbf16>
    %cst_43 = arith.constant dense<0.000000e+00> : vector<16x32xf32>
    %63 = tpu.matmul %51, %62, %cst_43 {dimension_numbers = #tpu.dot_dimension_numbers<[1], [0], [0], [1], [0, 0, 1, 1], [], []>} : vector<16x32xbf16>, vector<32x32xbf16>, vector<16x32xf32> -> vector<16x32xf32>
    %64 = vector.shape_cast %63 : vector<16x32xf32> to vector<2x8x32xf32>
    %c0_44 = arith.constant 0 : index
    %c0_45 = arith.constant 0 : index
    %65 = vector.load %arg16[%c0_44, %c0_45] : memref<8x32xf32, #tpu.memory_space<vmem>>, vector<8x32xf32>
    %66 = vector.shape_cast %65 : vector<8x32xf32> to vector<1x8x32xf32>
    %67 = vector.broadcast %66 : vector<1x8x32xf32> to vector<2x8x32xf32>
    %68 = arith.mulf %64, %67 : vector<2x8x32xf32>
    %c0_46 = arith.constant 0 : index
    %c0_47 = arith.constant 0 : index
    %69 = vector.load %arg17[%c0_46, %c0_47] : memref<8x32xf32, #tpu.memory_space<vmem>>, vector<8x32xf32>
    %70 = vector.shape_cast %69 : vector<8x32xf32> to vector<1x8x32xf32>
    %71 = vector.broadcast %70 : vector<1x8x32xf32> to vector<2x8x32xf32>
    %72 = arith.addf %68, %71 : vector<2x8x32xf32>
    %cst_48 = arith.constant 2.000000e+00 : f32
    %73 = vector.broadcast %cst_48 : f32 to vector<2x8x32xf32>
    %74 = arith.cmpf oge, %72, %73 : vector<2x8x32xf32>
    %75 = arith.extui %74 : vector<2x8x32xi1> to vector<2x8x32xi32>
    %76 = arith.sitofp %75 : vector<2x8x32xi32> to vector<2x8x32xf32>
    %77 = arith.truncf %76 : vector<2x8x32xf32> to vector<2x8x32xbf16>
    %78 = vector.shape_cast %77 : vector<2x8x32xbf16> to vector<16x32xbf16>
    %c0_49 = arith.constant 0 : index
    %c0_50 = arith.constant 0 : index
    %79 = vector.load %arg5[%c0_49, %c0_50] : memref<32x32xbf16, #tpu.memory_space<vmem>>, vector<32x32xbf16>
    %cst_51 = arith.constant dense<0.000000e+00> : vector<16x32xf32>
    %80 = tpu.matmul %78, %79, %cst_51 {dimension_numbers = #tpu.dot_dimension_numbers<[1], [0], [0], [1], [0, 0, 1, 1], [], []>} : vector<16x32xbf16>, vector<32x32xbf16>, vector<16x32xf32> -> vector<16x32xf32>
    %81 = vector.shape_cast %80 : vector<16x32xf32> to vector<2x8x32xf32>
    %c0_52 = arith.constant 0 : index
    %c0_53 = arith.constant 0 : index
    %82 = vector.load %arg18[%c0_52, %c0_53] : memref<8x32xf32, #tpu.memory_space<vmem>>, vector<8x32xf32>
    %83 = vector.shape_cast %82 : vector<8x32xf32> to vector<1x8x32xf32>
    %84 = vector.broadcast %83 : vector<1x8x32xf32> to vector<2x8x32xf32>
    %85 = arith.mulf %81, %84 : vector<2x8x32xf32>
    %c0_54 = arith.constant 0 : index
    %c0_55 = arith.constant 0 : index
    %86 = vector.load %arg19[%c0_54, %c0_55] : memref<8x32xf32, #tpu.memory_space<vmem>>, vector<8x32xf32>
    %87 = vector.shape_cast %86 : vector<8x32xf32> to vector<1x8x32xf32>
    %88 = vector.broadcast %87 : vector<1x8x32xf32> to vector<2x8x32xf32>
    %89 = arith.addf %85, %88 : vector<2x8x32xf32>
    %90 = arith.addf %89, %61 : vector<2x8x32xf32>
    %cst_56 = arith.constant 2.000000e+00 : f32
    %91 = vector.broadcast %cst_56 : f32 to vector<2x8x32xf32>
    %92 = arith.cmpf oge, %90, %91 : vector<2x8x32xf32>
    %93 = arith.extui %92 : vector<2x8x32xi1> to vector<2x8x32xi32>
    %94 = arith.sitofp %93 : vector<2x8x32xi32> to vector<2x8x32xf32>
    %c0_57 = arith.constant 0 : index
    %c0_58 = arith.constant 0 : index
    %c0_59 = arith.constant 0 : index
    %95 = vector.load %arg20[%c0_57, %c0_58, %c0_59] : memref<2x8x32xf32, #tpu.memory_space<vmem>>, vector<2x8x32xf32>
    tpu.vector_store %arg20[%c0_57, %c0_58, %c0_59], %94 {strides = array<i32>} : memref<2x8x32xf32, #tpu.memory_space<vmem>>, vector<2x8x32xf32>,
    return
  }
  func.func @transform_0(%arg0: i32) -> (i32, i32, i32) {
    %c0_i32 = arith.constant 0 : i32
    %c0_i32_0 = arith.constant 0 : i32
    %c0_i32_1 = arith.constant 0 : i32
    return %arg0, %c0_i32, %c0_i32_0 : i32, i32, i32
  }
  func.func @transform_1(%arg0: i32) -> (i32, i32) {
    %c0_i32 = arith.constant 0 : i32
    %c0_i32_0 = arith.constant 0 : i32
    %c0_i32_1 = arith.constant 0 : i32
    return %c0_i32, %c0_i32_0 : i32, i32
  }
  func.func @transform_2(%arg0: i32) -> (i32, i32) {
    %c0_i32 = arith.constant 0 : i32
    %c0_i32_0 = arith.constant 0 : i32
    %c0_i32_1 = arith.constant 0 : i32
    return %c0_i32, %c0_i32_0 : i32, i32
  }
  func.func @transform_3(%arg0: i32) -> (i32, i32) {
    %c0_i32 = arith.constant 0 : i32
    %c0_i32_0 = arith.constant 0 : i32
    %c0_i32_1 = arith.constant 0 : i32
    return %c0_i32, %c0_i32_0 : i32, i32
  }
  func.func @transform_4(%arg0: i32) -> (i32, i32) {
    %c0_i32 = arith.constant 0 : i32
    %c0_i32_0 = arith.constant 0 : i32
    %c0_i32_1 = arith.constant 0 : i32
    return %c0_i32, %c0_i32_0 : i32, i32
  }
  func.func @transform_5(%arg0: i32) -> (i32, i32) {
    %c0_i32 = arith.constant 0 : i32
    %c0_i32_0 = arith.constant 0 : i32
    %c0_i32_1 = arith.constant 0 : i32
    return %c0_i32, %c0_i32_0 : i32, i32
  }
  func.func @transform_6(%arg0: i32) -> (i32, i32) {
    %c0_i32 = arith.constant 0 : i32
    %c0_i32_0 = arith.constant 0 : i32
    %c0_i32_1 = arith.constant 0 : i32
    return %c0_i32, %c0_i32_0 : i32, i32
  }
  func.func @transform_7(%arg0: i32) -> (i32, i32) {
    %c0_i32 = arith.constant 0 : i32
    %c0_i32_0 = arith.constant 0 : i32
    %c0_i32_1 = arith.constant 0 : i32
    return %c0_i32, %c0_i32_0 : i32, i32
  }
  func.func @transform_8(%arg0: i32) -> (i32, i32) {
    %c0_i32 = arith.constant 0 : i32
    %c0_i32_0 = arith.constant 0 : i32
    %c0_i32_1 = arith.constant 0 : i32
    return %c0_i32, %c0_i32_0 : i32, i32
  }
  func.func @transform_9(%arg0: i32) -> (i32, i32) {
    %c0_i32 = arith.constant 0 : i32
    %c0_i32_0 = arith.constant 0 : i32
    %c0_i32_1 = arith.constant 0 : i32
    return %c0_i32, %c0_i32_0 : i32, i32
  }
  func.func @transform_10(%arg0: i32) -> (i32, i32) {
    %c0_i32 = arith.constant 0 : i32
    %c0_i32_0 = arith.constant 0 : i32
    %c0_i32_1 = arith.constant 0 : i32
    return %c0_i32, %c0_i32_0 : i32, i32
  }
  func.func @transform_11(%arg0: i32) -> (i32, i32) {
    %c0_i32 = arith.constant 0 : i32
    %c0_i32_0 = arith.constant 0 : i32
    %c0_i32_1 = arith.constant 0 : i32
    return %c0_i32, %c0_i32_0 : i32, i32
  }
  func.func @transform_12(%arg0: i32) -> (i32, i32) {
    %c0_i32 = arith.constant 0 : i32
    %c0_i32_0 = arith.constant 0 : i32
    %c0_i32_1 = arith.constant 0 : i32
    return %c0_i32, %c0_i32_0 : i32, i32
  }
  func.func @transform_13(%arg0: i32) -> (i32, i32) {
    %c0_i32 = arith.constant 0 : i32
    %c0_i32_0 = arith.constant 0 : i32
    %c0_i32_1 = arith.constant 0 : i32
    return %c0_i32, %c0_i32_0 : i32, i32
  }
  func.func @transform_14(%arg0: i32) -> (i32, i32) {
    %c0_i32 = arith.constant 0 : i32
    %c0_i32_0 = arith.constant 0 : i32
    %c0_i32_1 = arith.constant 0 : i32
    return %c0_i32, %c0_i32_0 : i32, i32
  }
  func.func @transform_15(%arg0: i32) -> (i32, i32) {
    %c0_i32 = arith.constant 0 : i32
    %c0_i32_0 = arith.constant 0 : i32
    %c0_i32_1 = arith.constant 0 : i32
    return %c0_i32, %c0_i32_0 : i32, i32
  }
  func.func @transform_16(%arg0: i32) -> (i32, i32) {
    %c0_i32 = arith.constant 0 : i32
    %c0_i32_0 = arith.constant 0 : i32
    %c0_i32_1 = arith.constant 0 : i32
    return %c0_i32, %c0_i32_0 : i32, i32
  }
  func.func @transform_17(%arg0: i32) -> (i32, i32) {
    %c0_i32 = arith.constant 0 : i32
    %c0_i32_0 = arith.constant 0 : i32
    %c0_i32_1 = arith.constant 0 : i32
    return %c0_i32, %c0_i32_0 : i32, i32
  }
  func.func @transform_18(%arg0: i32) -> (i32, i32) {
    %c0_i32 = arith.constant 0 : i32
    %c0_i32_0 = arith.constant 0 : i32
    %c0_i32_1 = arith.constant 0 : i32
    return %c0_i32, %c0_i32_0 : i32, i32
  }
  func.func @transform_19(%arg0: i32) -> (i32, i32, i32) {
    %c0_i32 = arith.constant 0 : i32
    %c0_i32_0 = arith.constant 0 : i32
    %c0_i32_1 = arith.constant 0 : i32
    return %arg0, %c0_i32, %c0_i32_0 : i32, i32, i32
  }
}

module attributes {stable_mosaic.version = 11 : i64} {
  func.func @mixer_block_kernel(%arg0: i32, %arg1: memref<2x8x32xf32, #tpu.memory_space<vmem>>, %arg2: memref<16x8xbf16, #tpu.memory_space<vmem>>, %arg3: memref<8x16xbf16, #tpu.memory_space<vmem>>, %arg4: memref<32x32xbf16, #tpu.memory_space<vmem>>, %arg5: memref<32x32xbf16, #tpu.memory_space<vmem>>, %arg6: memref<16x1xf32, #tpu.memory_space<vmem>>, %arg7: memref<8x1xf32, #tpu.memory_space<vmem>>, %arg8: memref<1x64xf32, #tpu.memory_space<vmem>>, %arg9: memref<1x64xf32, #tpu.memory_space<vmem>>, %arg10: memref<1x64xf32, #tpu.memory_space<vmem>>, %arg11: memref<1x64xf32, #tpu.memory_space<vmem>>, %arg12: memref<1x64xf32, #tpu.memory_space<vmem>>, %arg13: memref<1x64xf32, #tpu.memory_space<vmem>>, %arg14: memref<8x32xf32, #tpu.memory_space<vmem>>, %arg15: memref<8x32xf32, #tpu.memory_space<vmem>>, %arg16: memref<8x32xf32, #tpu.memory_space<vmem>>, %arg17: memref<8x32xf32, #tpu.memory_space<vmem>>, %arg18: memref<8x32xf32, #tpu.memory_space<vmem>>, %arg19: memref<8x32xf32, #tpu.memory_space<vmem>>, %arg20: memref<2x8x32xf32, #tpu.memory_space<vmem>>, %arg21: memref<8x64xf32, #tpu.memory_space<vmem>>, %arg22: memref<16x32xbf16, #tpu.memory_space<vmem>>) attributes {dimension_semantics = [#tpu.dimension_semantics<parallel>], iteration_bounds = array<i64: 1>, scalar_prefetch = 0 : i64, scratch_operands = 2 : i64, tpu.core_type = #tpu.core_type<tc>, window_params = [{transform_indices = @transform_0, window_bounds = array<i64: 2, 8, 32>}, {pipeline_mode = #tpu.pipeline_mode<synchronous>, transform_indices = @transform_1, window_bounds = array<i64: 16, 8>}, {pipeline_mode = #tpu.pipeline_mode<synchronous>, transform_indices = @transform_2, window_bounds = array<i64: 8, 16>}, {pipeline_mode = #tpu.pipeline_mode<synchronous>, transform_indices = @transform_3, window_bounds = array<i64: 32, 32>}, {pipeline_mode = #tpu.pipeline_mode<synchronous>, transform_indices = @transform_4, window_bounds = array<i64: 32, 32>}, {pipeline_mode = #tpu.pipeline_mode<synchronous>, transform_indices = @transform_5, window_bounds = array<i64: 16, 1>}, {pipeline_mode = #tpu.pipeline_mode<synchronous>, transform_indices = @transform_6, window_bounds = array<i64: 8, 1>}, {pipeline_mode = #tpu.pipeline_mode<synchronous>, transform_indices = @transform_7, window_bounds = array<i64: 1, 64>}, {pipeline_mode = #tpu.pipeline_mode<synchronous>, transform_indices = @transform_8, window_bounds = array<i64: 1, 64>}, {pipeline_mode = #tpu.pipeline_mode<synchronous>, transform_indices = @transform_9, window_bounds = array<i64: 1, 64>}, {pipeline_mode = #tpu.pipeline_mode<synchronous>, transform_indices = @transform_10, window_bounds = array<i64: 1, 64>}, {pipeline_mode = #tpu.pipeline_mode<synchronous>, transform_indices = @transform_11, window_bounds = array<i64: 1, 64>}, {pipeline_mode = #tpu.pipeline_mode<synchronous>, transform_indices = @transform_12, window_bounds = array<i64: 1, 64>}, {pipeline_mode = #tpu.pipeline_mode<synchronous>, transform_indices = @transform_13, window_bounds = array<i64: 8, 32>}, {pipeline_mode = #tpu.pipeline_mode<synchronous>, transform_indices = @transform_14, window_bounds = array<i64: 8, 32>}, {pipeline_mode = #tpu.pipeline_mode<synchronous>, transform_indices = @transform_15, window_bounds = array<i64: 8, 32>}, {pipeline_mode = #tpu.pipeline_mode<synchronous>, transform_indices = @transform_16, window_bounds = array<i64: 8, 32>}, {pipeline_mode = #tpu.pipeline_mode<synchronous>, transform_indices = @transform_17, window_bounds = array<i64: 8, 32>}, {pipeline_mode = #tpu.pipeline_mode<synchronous>, transform_indices = @transform_18, window_bounds = array<i64: 8, 32>}, {transform_indices = @transform_19, window_bounds = array<i64: 2, 8, 32>}]} {
    %c0 = arith.constant 0 : index
    %c0_0 = arith.constant 0 : index
    %c0_1 = arith.constant 0 : index
    %0 = vector.load %arg1[%c0, %c0_0, %c0_1] : memref<2x8x32xf32, #tpu.memory_space<vmem>>, vector<1x8x32xf32>
    %1 = vector.shape_cast %0 : vector<1x8x32xf32> to vector<8x32xf32>
    %c0_2 = arith.constant 0 : index
    %c0_3 = arith.constant 0 : index
    %2 = vector.load %arg21[%c0_2, %c0_3] : memref<8x64xf32, #tpu.memory_space<vmem>>, vector<8x32xf32>
    tpu.vector_store %arg21[%c0_2, %c0_3], %1 {strides = array<i32>} : memref<8x64xf32, #tpu.memory_space<vmem>>, vector<8x32xf32>,
    %c1 = arith.constant 1 : index
    %c0_4 = arith.constant 0 : index
    %c0_5 = arith.constant 0 : index
    %3 = vector.load %arg1[%c1, %c0_4, %c0_5] : memref<2x8x32xf32, #tpu.memory_space<vmem>>, vector<1x8x32xf32>
    %4 = vector.shape_cast %3 : vector<1x8x32xf32> to vector<8x32xf32>
    %c0_6 = arith.constant 0 : index
    %c32 = arith.constant 32 : index
    %5 = vector.load %arg21[%c0_6, %c32] : memref<8x64xf32, #tpu.memory_space<vmem>>, vector<8x32xf32>
    tpu.vector_store %arg21[%c0_6, %c32], %4 {strides = array<i32>} : memref<8x64xf32, #tpu.memory_space<vmem>>, vector<8x32xf32>,
    %c0_7 = arith.constant 0 : index
    %c0_8 = arith.constant 0 : index
    %6 = vector.load %arg21[%c0_7, %c0_8] : memref<8x64xf32, #tpu.memory_space<vmem>>, vector<8x64xf32>
    %c0_9 = arith.constant 0 : index
    %c0_10 = arith.constant 0 : index
    %7 = vector.load %arg8[%c0_9, %c0_10] : memref<1x64xf32, #tpu.memory_space<vmem>>, vector<1x64xf32>
    %8 = vector.broadcast %7 : vector<1x64xf32> to vector<8x64xf32>
    %9 = arith.mulf %6, %8 : vector<8x64xf32>
    %c0_11 = arith.constant 0 : index
    %c0_12 = arith.constant 0 : index
    %10 = vector.load %arg9[%c0_11, %c0_12] : memref<1x64xf32, #tpu.memory_space<vmem>>, vector<1x64xf32>
    %11 = vector.broadcast %10 : vector<1x64xf32> to vector<8x64xf32>
    %12 = arith.addf %9, %11 : vector<8x64xf32>
    %c0_13 = arith.constant 0 : index
    %c0_14 = arith.constant 0 : index
    %13 = vector.load %arg2[%c0_13, %c0_14] : memref<16x8xbf16, #tpu.memory_space<vmem>>, vector<16x8xbf16>
    %14 = arith.truncf %6 : vector<8x64xf32> to vector<8x64xbf16>
    %cst = arith.constant dense<0.000000e+00> : vector<16x64xf32>
    %15 = tpu.matmul %13, %14, %cst {dimension_numbers = #tpu.dot_dimension_numbers<[1], [0], [0], [1], [0, 0, 1, 1], [], []>} : vector<16x8xbf16>, vector<8x64xbf16>, vector<16x64xf32> -> vector<16x64xf32>
    %c0_15 = arith.constant 0 : index
    %c0_16 = arith.constant 0 : index
    %16 = vector.load %arg6[%c0_15, %c0_16] : memref<16x1xf32, #tpu.memory_space<vmem>>, vector<16x1xf32>
    %17 = vector.broadcast %16 : vector<16x1xf32> to vector<16x64xf32>
    %18 = arith.addf %15, %17 : vector<16x64xf32>
    %c0_17 = arith.constant 0 : index
    %c0_18 = arith.constant 0 : index
    %19 = vector.load %arg10[%c0_17, %c0_18] : memref<1x64xf32, #tpu.memory_space<vmem>>, vector<1x64xf32>
    %20 = vector.broadcast %19 : vector<1x64xf32> to vector<16x64xf32>
    %21 = arith.mulf %18, %20 : vector<16x64xf32>
    %c0_19 = arith.constant 0 : index
    %c0_20 = arith.constant 0 : index
    %22 = vector.load %arg11[%c0_19, %c0_20] : memref<1x64xf32, #tpu.memory_space<vmem>>, vector<1x64xf32>
    %23 = vector.broadcast %22 : vector<1x64xf32> to vector<16x64xf32>
    %24 = arith.addf %21, %23 : vector<16x64xf32>
    %cst_21 = arith.constant 2.000000e+00 : f32
    %25 = vector.broadcast %cst_21 : f32 to vector<16x64xf32>
    %26 = arith.cmpf oge, %24, %25 : vector<16x64xf32>
    %27 = arith.extui %26 : vector<16x64xi1> to vector<16x64xi32>
    %28 = arith.sitofp %27 : vector<16x64xi32> to vector<16x64xf32>
    %29 = arith.truncf %28 : vector<16x64xf32> to vector<16x64xbf16>
    %c0_22 = arith.constant 0 : index
    %c0_23 = arith.constant 0 : index
    %30 = vector.load %arg3[%c0_22, %c0_23] : memref<8x16xbf16, #tpu.memory_space<vmem>>, vector<8x16xbf16>
    %cst_24 = arith.constant dense<0.000000e+00> : vector<8x64xf32>
    %31 = tpu.matmul %30, %29, %cst_24 {dimension_numbers = #tpu.dot_dimension_numbers<[1], [0], [0], [1], [0, 0, 1, 1], [], []>} : vector<8x16xbf16>, vector<16x64xbf16>, vector<8x64xf32> -> vector<8x64xf32>
    %c0_25 = arith.constant 0 : index
    %c0_26 = arith.constant 0 : index
    %32 = vector.load %arg7[%c0_25, %c0_26] : memref<8x1xf32, #tpu.memory_space<vmem>>, vector<8x1xf32>
    %33 = vector.broadcast %32 : vector<8x1xf32> to vector<8x64xf32>
    %34 = arith.addf %31, %33 : vector<8x64xf32>
    %c0_27 = arith.constant 0 : index
    %c0_28 = arith.constant 0 : index
    %35 = vector.load %arg12[%c0_27, %c0_28] : memref<1x64xf32, #tpu.memory_space<vmem>>, vector<1x64xf32>
    %36 = vector.broadcast %35 : vector<1x64xf32> to vector<8x64xf32>
    %37 = arith.mulf %34, %36 : vector<8x64xf32>
    %c0_29 = arith.constant 0 : index
    %c0_30 = arith.constant 0 : index
    %38 = vector.load %arg13[%c0_29, %c0_30] : memref<1x64xf32, #tpu.memory_space<vmem>>, vector<1x64xf32>
    %39 = vector.broadcast %38 : vector<1x64xf32> to vector<8x64xf32>
    %40 = arith.addf %37, %39 : vector<8x64xf32>
    %41 = arith.addf %40, %12 : vector<8x64xf32>
    %cst_31 = arith.constant 2.000000e+00 : f32
    %42 = vector.broadcast %cst_31 : f32 to vector<8x64xf32>
    %43 = arith.cmpf oge, %41, %42 : vector<8x64xf32>
    %44 = arith.extui %43 : vector<8x64xi1> to vector<8x64xi32>
    %45 = arith.sitofp %44 : vector<8x64xi32> to vector<8x64xf32>
    %46 = arith.truncf %45 : vector<8x64xf32> to vector<8x64xbf16>
    %47 = vector.extract_strided_slice %46 {offsets = [0, 0], sizes = [8, 32], strides = [1, 1]} : vector<8x64xbf16> to vector<8x32xbf16>
    %c0_32 = arith.constant 0 : index
    %c0_33 = arith.constant 0 : index
    %48 = vector.load %arg22[%c0_32, %c0_33] : memref<16x32xbf16, #tpu.memory_space<vmem>>, vector<8x32xbf16>
    tpu.vector_store %arg22[%c0_32, %c0_33], %47 {strides = array<i32>} : memref<16x32xbf16, #tpu.memory_space<vmem>>, vector<8x32xbf16>,
    %49 = vector.extract_strided_slice %46 {offsets = [0, 32], sizes = [8, 32], strides = [1, 1]} : vector<8x64xbf16> to vector<8x32xbf16>
    %c8 = arith.constant 8 : index
    %c0_34 = arith.constant 0 : index
    %50 = vector.load %arg22[%c8, %c0_34] : memref<16x32xbf16, #tpu.memory_space<vmem>>, vector<8x32xbf16>
    tpu.vector_store %arg22[%c8, %c0_34], %49 {strides = array<i32>} : memref<16x32xbf16, #tpu.memory_space<vmem>>, vector<8x32xbf16>,
    %c0_35 = arith.constant 0 : index
    %c0_36 = arith.constant 0 : index
    %51 = vector.load %arg22[%c0_35, %c0_36] : memref<16x32xbf16, #tpu.memory_space<vmem>>, vector<16x32xbf16>
    %52 = vector.shape_cast %51 : vector<16x32xbf16> to vector<2x8x32xbf16>
    %c0_37 = arith.constant 0 : index
    %c0_38 = arith.constant 0 : index
    %53 = vector.load %arg14[%c0_37, %c0_38] : memref<8x32xf32, #tpu.memory_space<vmem>>, vector<8x32xf32>
    %54 = vector.shape_cast %53 : vector<8x32xf32> to vector<1x8x32xf32>
    %55 = arith.extf %52 : vector<2x8x32xbf16> to vector<2x8x32xf32>
    %56 = vector.broadcast %54 : vector<1x8x32xf32> to vector<2x8x32xf32>
    %57 = arith.mulf %55, %56 : vector<2x8x32xf32>
    %c0_39 = arith.constant 0 : index
    %c0_40 = arith.constant 0 : index
    %58 = vector.load %arg15[%c0_39, %c0_40] : memref<8x32xf32, #tpu.memory_space<vmem>>, vector<8x32xf32>
    %59 = vector.shape_cast %58 : vector<8x32xf32> to vector<1x8x32xf32>
    %60 = vector.broadcast %59 : vector<1x8x32xf32> to vector<2x8x32xf32>
    %61 = arith.addf %57, %60 : vector<2x8x32xf32>
    %c0_41 = arith.constant 0 : index
    %c0_42 = arith.constant 0 : index
    %62 = vector.load %arg4[%c0_41, %c0_42] : memref<32x32xbf16, #tpu.memory_space<vmem>>, vector<32x32xbf16>
    %cst_43 = arith.constant dense<0.000000e+00> : vector<16x32xf32>
    %63 = tpu.matmul %51, %62, %cst_43 {dimension_numbers = #tpu.dot_dimension_numbers<[1], [0], [0], [1], [0, 0, 1, 1], [], []>} : vector<16x32xbf16>, vector<32x32xbf16>, vector<16x32xf32> -> vector<16x32xf32>
    %64 = vector.shape_cast %63 : vector<16x32xf32> to vector<2x8x32xf32>
    %c0_44 = arith.constant 0 : index
    %c0_45 = arith.constant 0 : index
    %65 = vector.load %arg16[%c0_44, %c0_45] : memref<8x32xf32, #tpu.memory_space<vmem>>, vector<8x32xf32>
    %66 = vector.shape_cast %65 : vector<8x32xf32> to vector<1x8x32xf32>
    %67 = vector.broadcast %66 : vector<1x8x32xf32> to vector<2x8x32xf32>
    %68 = arith.mulf %64, %67 : vector<2x8x32xf32>
    %c0_46 = arith.constant 0 : index
    %c0_47 = arith.constant 0 : index
    %69 = vector.load %arg17[%c0_46, %c0_47] : memref<8x32xf32, #tpu.memory_space<vmem>>, vector<8x32xf32>
    %70 = vector.shape_cast %69 : vector<8x32xf32> to vector<1x8x32xf32>
    %71 = vector.broadcast %70 : vector<1x8x32xf32> to vector<2x8x32xf32>
    %72 = arith.addf %68, %71 : vector<2x8x32xf32>
    %cst_48 = arith.constant 2.000000e+00 : f32
    %73 = vector.broadcast %cst_48 : f32 to vector<2x8x32xf32>
    %74 = arith.cmpf oge, %72, %73 : vector<2x8x32xf32>
    %75 = arith.extui %74 : vector<2x8x32xi1> to vector<2x8x32xi32>
    %76 = arith.sitofp %75 : vector<2x8x32xi32> to vector<2x8x32xf32>
    %77 = arith.truncf %76 : vector<2x8x32xf32> to vector<2x8x32xbf16>
    %78 = vector.shape_cast %77 : vector<2x8x32xbf16> to vector<16x32xbf16>
    %c0_49 = arith.constant 0 : index
    %c0_50 = arith.constant 0 : index
    %79 = vector.load %arg5[%c0_49, %c0_50] : memref<32x32xbf16, #tpu.memory_space<vmem>>, vector<32x32xbf16>
    %cst_51 = arith.constant dense<0.000000e+00> : vector<16x32xf32>
    %80 = tpu.matmul %78, %79, %cst_51 {dimension_numbers = #tpu.dot_dimension_numbers<[1], [0], [0], [1], [0, 0, 1, 1], [], []>} : vector<16x32xbf16>, vector<32x32xbf16>, vector<16x32xf32> -> vector<16x32xf32>
    %81 = vector.shape_cast %80 : vector<16x32xf32> to vector<2x8x32xf32>
    %c0_52 = arith.constant 0 : index
    %c0_53 = arith.constant 0 : index
    %82 = vector.load %arg18[%c0_52, %c0_53] : memref<8x32xf32, #tpu.memory_space<vmem>>, vector<8x32xf32>
    %83 = vector.shape_cast %82 : vector<8x32xf32> to vector<1x8x32xf32>
    %84 = vector.broadcast %83 : vector<1x8x32xf32> to vector<2x8x32xf32>
    %85 = arith.mulf %81, %84 : vector<2x8x32xf32>
    %c0_54 = arith.constant 0 : index
    %c0_55 = arith.constant 0 : index
    %86 = vector.load %arg19[%c0_54, %c0_55] : memref<8x32xf32, #tpu.memory_space<vmem>>, vector<8x32xf32>
    %87 = vector.shape_cast %86 : vector<8x32xf32> to vector<1x8x32xf32>
    %88 = vector.broadcast %87 : vector<1x8x32xf32> to vector<2x8x32xf32>
    %89 = arith.addf %85, %88 : vector<2x8x32xf32>
    %90 = arith.addf %89, %61 : vector<2x8x32xf32>
    %cst_56 = arith.constant 2.000000e+00 : f32
    %91 = vector.broadcast %cst_56 : f32 to vector<2x8x32xf32>
    %92 = arith.cmpf oge, %90, %91 : vector<2x8x32xf32>
    %93 = arith.extui %92 : vector<2x8x32xi1> to vector<2x8x32xi32>
    %94 = arith.sitofp %93 : vector<2x8x32xi32> to vector<2x8x32xf32>
    %c0_57 = arith.constant 0 : index
    %c0_58 = arith.constant 0 : index
    %c0_59 = arith.constant 0 : index
    %95 = vector.load %arg20[%c0_57, %c0_58, %c0_59] : memref<2x8x32xf32, #tpu.memory_space<vmem>>, vector<2x8x32xf32>
    tpu.vector_store %arg20[%c0_57, %c0_58, %c0_59], %94 {strides = array<i32>} : memref<2x8x32xf32, #tpu.memory_space<vmem>>, vector<2x8x32xf32>,
    return
  }
  func.func @transform_0(%arg0: i32) -> (i32, i32, i32) {
    %c0_i32 = arith.constant 0 : i32
    %c0_i32_0 = arith.constant 0 : i32
    %c0_i32_1 = arith.constant 0 : i32
    return %arg0, %c0_i32, %c0_i32_0 : i32, i32, i32
  }
  func.func @transform_1(%arg0: i32) -> (i32, i32) {
    %c0_i32 = arith.constant 0 : i32
    %c0_i32_0 = arith.constant 0 : i32
    %c0_i32_1 = arith.constant 0 : i32
    return %c0_i32, %c0_i32_0 : i32, i32
  }
  func.func @transform_2(%arg0: i32) -> (i32, i32) {
    %c0_i32 = arith.constant 0 : i32
    %c0_i32_0 = arith.constant 0 : i32
    %c0_i32_1 = arith.constant 0 : i32
    return %c0_i32, %c0_i32_0 : i32, i32
  }
  func.func @transform_3(%arg0: i32) -> (i32, i32) {
    %c0_i32 = arith.constant 0 : i32
    %c0_i32_0 = arith.constant 0 : i32
    %c0_i32_1 = arith.constant 0 : i32
    return %c0_i32, %c0_i32_0 : i32, i32
  }
  func.func @transform_4(%arg0: i32) -> (i32, i32) {
    %c0_i32 = arith.constant 0 : i32
    %c0_i32_0 = arith.constant 0 : i32
    %c0_i32_1 = arith.constant 0 : i32
    return %c0_i32, %c0_i32_0 : i32, i32
  }
  func.func @transform_5(%arg0: i32) -> (i32, i32) {
    %c0_i32 = arith.constant 0 : i32
    %c0_i32_0 = arith.constant 0 : i32
    %c0_i32_1 = arith.constant 0 : i32
    return %c0_i32, %c0_i32_0 : i32, i32
  }
  func.func @transform_6(%arg0: i32) -> (i32, i32) {
    %c0_i32 = arith.constant 0 : i32
    %c0_i32_0 = arith.constant 0 : i32
    %c0_i32_1 = arith.constant 0 : i32
    return %c0_i32, %c0_i32_0 : i32, i32
  }
  func.func @transform_7(%arg0: i32) -> (i32, i32) {
    %c0_i32 = arith.constant 0 : i32
    %c0_i32_0 = arith.constant 0 : i32
    %c0_i32_1 = arith.constant 0 : i32
    return %c0_i32, %c0_i32_0 : i32, i32
  }
  func.func @transform_8(%arg0: i32) -> (i32, i32) {
    %c0_i32 = arith.constant 0 : i32
    %c0_i32_0 = arith.constant 0 : i32
    %c0_i32_1 = arith.constant 0 : i32
    return %c0_i32, %c0_i32_0 : i32, i32
  }
  func.func @transform_9(%arg0: i32) -> (i32, i32) {
    %c0_i32 = arith.constant 0 : i32
    %c0_i32_0 = arith.constant 0 : i32
    %c0_i32_1 = arith.constant 0 : i32
    return %c0_i32, %c0_i32_0 : i32, i32
  }
  func.func @transform_10(%arg0: i32) -> (i32, i32) {
    %c0_i32 = arith.constant 0 : i32
    %c0_i32_0 = arith.constant 0 : i32
    %c0_i32_1 = arith.constant 0 : i32
    return %c0_i32, %c0_i32_0 : i32, i32
  }
  func.func @transform_11(%arg0: i32) -> (i32, i32) {
    %c0_i32 = arith.constant 0 : i32
    %c0_i32_0 = arith.constant 0 : i32
    %c0_i32_1 = arith.constant 0 : i32
    return %c0_i32, %c0_i32_0 : i32, i32
  }
  func.func @transform_12(%arg0: i32) -> (i32, i32) {
    %c0_i32 = arith.constant 0 : i32
    %c0_i32_0 = arith.constant 0 : i32
    %c0_i32_1 = arith.constant 0 : i32
    return %c0_i32, %c0_i32_0 : i32, i32
  }
  func.func @transform_13(%arg0: i32) -> (i32, i32) {
    %c0_i32 = arith.constant 0 : i32
    %c0_i32_0 = arith.constant 0 : i32
    %c0_i32_1 = arith.constant 0 : i32
    return %c0_i32, %c0_i32_0 : i32, i32
  }
  func.func @transform_14(%arg0: i32) -> (i32, i32) {
    %c0_i32 = arith.constant 0 : i32
    %c0_i32_0 = arith.constant 0 : i32
    %c0_i32_1 = arith.constant 0 : i32
    return %c0_i32, %c0_i32_0 : i32, i32
  }
  func.func @transform_15(%arg0: i32) -> (i32, i32) {
    %c0_i32 = arith.constant 0 : i32
    %c0_i32_0 = arith.constant 0 : i32
    %c0_i32_1 = arith.constant 0 : i32
    return %c0_i32, %c0_i32_0 : i32, i32
  }
  func.func @transform_16(%arg0: i32) -> (i32, i32) {
    %c0_i32 = arith.constant 0 : i32
    %c0_i32_0 = arith.constant 0 : i32
    %c0_i32_1 = arith.constant 0 : i32
    return %c0_i32, %c0_i32_0 : i32, i32
  }
  func.func @transform_17(%arg0: i32) -> (i32, i32) {
    %c0_i32 = arith.constant 0 : i32
    %c0_i32_0 = arith.constant 0 : i32
    %c0_i32_1 = arith.constant 0 : i32
    return %c0_i32, %c0_i32_0 : i32, i32
  }
  func.func @transform_18(%arg0: i32) -> (i32, i32) {
    %c0_i32 = arith.constant 0 : i32
    %c0_i32_0 = arith.constant 0 : i32
    %c0_i32_1 = arith.constant 0 : i32
    return %c0_i32, %c0_i32_0 : i32, i32
  }
  func.func @transform_19(%arg0: i32) -> (i32, i32, i32) {
    %c0_i32 = arith.constant 0 : i32
    %c0_i32_0 = arith.constant 0 : i32
    %c0_i32_1 = arith.constant 0 : i32
    return %arg0, %c0_i32, %c0_i32_0 : i32, i32, i32
  }
}

</mosaic_0001>

<bundles_post_ra>
// kernel: tpu_custom_call.1
= control target key start
LH: loop header
LB: loop body
LE: loop exit
PB: predicated region body
PF: predicated region fallthrough
CT: control target
= control target key end

     0   :  { %s1059_s0 = inlined_call_operand.vmem [shape: f32[2,8,32], index: 0, kind: input, shape index: {}]   ;;  %s1060_s1 = inlined_call_operand.vmem [shape: bf16[16,8], index: 1, kind: input, shape index: {}]   ;;  %s1061_s2 = inlined_call_operand.hbm [shape: bf16[8,16], index: 2, kind: input, shape index: {}]   ;;  %s1062_s3 = inlined_call_operand.vmem [shape: bf16[32,32], index: 3, kind: input, shape index: {}]   ;;  %s1063_s4 = inlined_call_operand.hbm [shape: bf16[32,32], index: 4, kind: input, shape index: {}]   ;;  %s1064_s5 = inlined_call_operand.vmem [shape: f32[16,1], index: 5, kind: input, shape index: {}]   ;;  %s1065_s6 = inlined_call_operand.vmem [shape: f32[8,1], index: 6, kind: input, shape index: {}]   ;;  %s1066_s7 = inlined_call_operand.vmem [shape: f32[1,64], index: 7, kind: input, shape index: {}]   ;;  %s1067_s8 = inlined_call_operand.hbm [shape: f32[1,64], index: 8, kind: input, shape index: {}]   ;;  %s1068_s9 = inlined_call_operand.hbm [shape: f32[1,64], index: 9, kind: input, shape index: {}]   ;;  %s1069_s10 = inlined_call_operand.hbm [shape: f32[1,64], index: 10, kind: input, shape index: {}]   ;;  %s1070_s11 = inlined_call_operand.hbm [shape: f32[1,64], index: 11, kind: input, shape index: {}]   ;;  %s1071_s12 = inlined_call_operand.hbm [shape: f32[1,64], index: 12, kind: input, shape index: {}]   ;;  %s1072_s13 = inlined_call_operand.vmem [shape: f32[8,32], index: 13, kind: input, shape index: {}]   ;;  %s1073_s14 = inlined_call_operand.vmem [shape: f32[8,32], index: 14, kind: input, shape index: {}]   ;;  %s1074_s15 = inlined_call_operand.hbm [shape: f32[8,32], index: 15, kind: input, shape index: {}]   ;;  %s1075_s16 = inlined_call_operand.hbm [shape: f32[8,32], index: 16, kind: input, shape index: {}]   ;;  %s1076_s17 = inlined_call_operand.hbm [shape: f32[8,32], index: 17, kind: input, shape index: {}]   ;;  %s1077_s18 = inlined_call_operand.hbm [shape: f32[8,32], index: 18, kind: input, shape index: {}]   ;;  %s1078_s19 = inlined_call_operand.hbm [shape: f32[2,8,32], index: 19, kind: output, shape index: {}]  }
   0x1   :  { %1081 = sst [smem:[#allocation30_spill]] %s1059_s0 }
   0x2   :  { %1082 = sst [smem:[#allocation31_spill]] %s1060_s1 }
   0x3   :  { %1083 = sst [smem:[#allocation32_spill]] %s1061_s2 }
   0x4   :  { %1084 = sst [smem:[#allocation33_spill]] %s1062_s3 }
   0x5   :  { %24 = vsyncpa [#allocation5], 0 }
   0x6   :  { %25 = vsyncpa [#allocation8], 0 }
   0x7   :  { %26 = vsyncpa [#allocation11], 0 }
   0x8   :  { %27 = vsyncpa [#allocation14], 0 }
   0x9   :  { %28 = vsyncpa [#allocation17], 0 }
   0xa   :  { %29 = vsyncpa [#allocation20], 0  ;;  %s52_s20 = sshll.u32 %s1063_s4, 4  ;;  %s53_s20 = int_to_ptr.hbm [resolvable:$true] %s52_s20 }
   0xb   :  { %30 = vsyncpa [#allocation6], 0  ;;  %s859_s21 = smov [#allocation7]   ;;  %s83_s23 = sshll.u32 %s1068_s9, 4  ;;  %s84_s23 = int_to_ptr.hbm [resolvable:$true] %s83_s23 }
   0xc   :  { %s54_s1 = sshll.u32 %s859_s21, 4  ;;  %s860_s24 = smov 64   ;;  %s55_s1 = int_to_ptr.vmem [resolvable:$true] %s54_s1 }
   0xd   :  { %s861_s25 = smov 4   ;;  %s862_s3 = smov [#allocation10]  }
   0xe   :  { %60 = dma.hbm_to_vmem [thread:$0]  %s53_s20, 256, %s55_s1, [#allocation8], %s860_s24, %s860_s24, %s861_s25  }
   0xf   :  { %s85_s26 = sshll.u32 %s862_s3, 4  ;;  %s105_s29 = sshll.u32 %s1070_s11, 4  ;;  %s86_s26 = int_to_ptr.vmem [resolvable:$true] %s85_s26  ;;  %s106_s29 = int_to_ptr.hbm [resolvable:$true] %s105_s29 }
  0x10   :  { %88 = dma.hbm_to_vmem [thread:$0]  %s84_s23, 16, %s86_s26, [#allocation11]  }
  0x11   :  { %s131_s30 = sshll.u32 %s1074_s15, 4  ;;  %s863_s21 = smov [#allocation13]   ;;  %s132_s30 = int_to_ptr.hbm [resolvable:$true] %s131_s30 }
  0x12   :  { %s107_s22 = sshll.u32 %s863_s21, 4  ;;  %s864_s9 = smov [#allocation16]   ;;  %s108_s22 = int_to_ptr.vmem [resolvable:$true] %s107_s22 }
  0x13   :  { %110 = dma.hbm_to_vmem [thread:$0]  %s106_s29, 16, %s108_s22, [#allocation14]  }
  0x14   :  { %s133_s20 = sshll.u32 %s864_s9, 4  ;;  %s153_s24 = sshll.u32 %s1076_s17, 4  ;;  %s134_s20 = int_to_ptr.vmem [resolvable:$true] %s133_s20  ;;  %s154_s24 = int_to_ptr.hbm [resolvable:$true] %s153_s24 }
  0x15   :  { %136 = dma.hbm_to_vmem [thread:$0]  %s132_s30, 128, %s134_s20, [#allocation17]  }
  0x16   :  { %s1085_s25 = sld [smem:[#allocation32_spill]]  ;;  %s865_s26 = smov [#allocation19]  }
  0x17   :  { %s155_s15 = sshll.u32 %s865_s26, 4  ;;  %s866_s27 = smov [#allocation4]   ;;  %s156_s15 = int_to_ptr.vmem [resolvable:$true] %s155_s15 }
  0x18   :  { %158 = dma.hbm_to_vmem [thread:$0]  %s154_s24, 128, %s156_s15, [#allocation20]  }
  0x19   :  { %s42_s28 = sshll.u32 %s866_s27, 4  ;;  %s72_s0 = sshll.u32 %s1067_s8, 4  ;;  %s43_s28 = int_to_ptr.vmem [resolvable:$true] %s42_s28  ;;  %s73_s0 = int_to_ptr.hbm [resolvable:$true] %s72_s0 }
  0x1a   :  { %s94_s21 = sshll.u32 %s1069_s10, 4  ;;  %s867_s22 = smov [#allocation9]   ;;  %s95_s21 = int_to_ptr.hbm [resolvable:$true] %s94_s21 }
  0x1b   :  { %s74_s9 = sshll.u32 %s867_s22, 4  ;;  %s868_s20 = smov [#allocation12]   ;;  %s75_s9 = int_to_ptr.vmem [resolvable:$true] %s74_s9 }
  0x1c   :  { %s40_s3 = sshll.u32 %s1085_s25, 4  ;;  %s96_s1 = sshll.u32 %s868_s20, 4  ;;  %s41_s3 = int_to_ptr.hbm [resolvable:$true] %s40_s3  ;;  %s97_s1 = int_to_ptr.vmem [resolvable:$true] %s96_s1 }
  0x1d   :  { %45 = dma.hbm_to_vmem [thread:$0]  %s41_s3, 64, %s43_s28, [#allocation5]  }
  0x1e   :  { %77 = dma.hbm_to_vmem [thread:$0]  %s73_s0, 16, %s75_s9, [#allocation8]  }
  0x1f   :  { %s116_s11 = sshll.u32 %s1071_s12, 4  ;;  %s142_s25 = sshll.u32 %s1075_s16, 4  ;;  %s117_s11 = int_to_ptr.hbm [resolvable:$true] %s116_s11  ;;  %s143_s25 = int_to_ptr.hbm [resolvable:$true] %s142_s25 }
  0x20   :  { %99 = dma.hbm_to_vmem [thread:$0]  %s95_s21, 16, %s97_s1, [#allocation11]  }
  0x21   :  { %s869_s3 = smov [#allocation15]   ;;  %s870_s26 = smov [#allocation18]  }
  0x22   :  { %s118_s10 = sshll.u32 %s869_s3, 4  ;;  %s144_s15 = sshll.u32 %s870_s26, 4  ;;  %s119_s10 = int_to_ptr.vmem [resolvable:$true] %s118_s10  ;;  %s145_s15 = int_to_ptr.vmem [resolvable:$true] %s144_s15 }
  0x23   :  { %121 = dma.hbm_to_vmem [thread:$0]  %s117_s11, 16, %s119_s10, [#allocation14]  }
  0x24   :  { %s164_s29 = sshll.u32 %s1077_s18, 4  ;;  %s871_s12 = smov [#allocation21]   ;;  %s165_s29 = int_to_ptr.hbm [resolvable:$true] %s164_s29 }
  0x25   :  { %147 = dma.hbm_to_vmem [thread:$0]  %s143_s25, 128, %s145_s15, [#allocation17]  }
  0x26   :  { %s166_s4 = sshll.u32 %s871_s12, 4  ;;  %s167_s4 = int_to_ptr.vmem [resolvable:$true] %s166_s4 }
  0x27   :  { %169 = dma.hbm_to_vmem [thread:$0]  %s165_s29, 128, %s167_s4, [#allocation20]  }
  0x28   :  { %845 = dma.done.wait [#allocation5], 64  }
  0x29   :  { %846 = vsyncadd [#allocation5], 4294967232 }
  0x2a   :  { %847 = dma.done.wait [#allocation8], 272  }
  0x2b   :  { %848 = vsyncadd [#allocation8], 4294967024 }
  0x2c   :  { %849 = dma.done.wait [#allocation11], 32  }
  0x2d   :  { %850 = vsyncadd [#allocation11], 4294967264 }
  0x2e   :  { %851 = dma.done.wait [#allocation14], 32  }
  0x2f   :  { %852 = vsyncadd [#allocation14], 4294967264 }
  0x30   :  { %853 = dma.done.wait [#allocation17], 256  }
  0x31   :  { %854 = vsyncadd [#allocation17], 4294967040 }
  0x32   :  { %855 = dma.done.wait [#allocation20], 256  }
  0x33   :  { %856 = vsyncadd [#allocation20], 4294967040  ;;  %s1086_s0 = sld [smem:[#allocation30_spill]]  ;;  %s872_s17 = smov 32   ;;  %vm216_vm0 = vcmask 261120   ;;  %v241_v2 = vld [vmem:[%s1064_s5 + $0x8] sm:$0xff] }
  0x34   :  { %v240_v3 = vld [vmem:[%s1064_s5] sm:$0xff]  ;;  %v873_v4 = vmov 0   ;;  %vm224_vm1 = vcmask 523520   ;;  %vm261_vm2 = vcmask 1043456   ;;  %s1087_s5 = sld [smem:[#allocation31_spill]]  ;;  %vm257_vm3 = vcmask 64512  }
  0x35   :  { %550 = vset.pattern.permute.xlu1 %v873_v4  ;;  %549 = vset.pattern.permute.xlu0 %v873_v4  ;;  %v299_v5 = vld [vmem:[%s1065_s6] sm:$0xff]  ;;  %v553_v16 = vld [vmem:[#allocation12] ss:$0 sm:$0xff]  ;;  %v874_v23 = vmov 1.0|1.0   ;;  %vm305_vm7 = vcmask 130048  }
  0x36   :  { %249 = vperm.xlu1 %550, %v241_v2   ;;  %v552_v14 = vld [vmem:[#allocation10] ss:$0 sm:$0xff]  ;;  %v298_v24 = vld [vmem:[#allocation4] sm:$0xf]  ;;  %v551_v25 = vld [vmem:[%s1066_s7] ss:$0 sm:$0xff] }
  0x37   :  { %v554_v26 = vld [vmem:[#allocation13] ss:$0 sm:$0xff]  ;;  %v555_v31 = vld [vmem:[#allocation15] ss:$0 sm:$0xff]  ;;  %v556_v32 = vld [vmem:[#allocation9] ss:$0 sm:$0xff] }
  0x38   :  { %v875_v38 = vmov 0.0   ;;  %vm337_vm9 = vcmask 257024   ;;  %s876_s25 = smov 96   ;;  %s1088_s10 = sld [smem:[#allocation33_spill]]  ;;  %v527_v45 = vld [vmem:[#allocation7 + $0x8] sm:$0xff]  ;;  %v526_v46 = vld [vmem:[#allocation7] sm:$0xff] }
  0x39   :  { %v484_v0 = vld [vmem:[%s1086_s0 + $0x8] sm:$0xff]  ;;  %v215_v1 = vld [vmem:[%s1086_s0] sm:$0xff]  ;;  %436 = vmatpush.bf16.msra.mxu3 %v527_v45  ;;  %v395_v49 = vld [vmem:[#allocation18] sm:$0xff]  ;;  %s466_s18 = sshll.u32 %s1078_s19, 4  ;;  %s878_s0 = smov 128   ;;  %s467_s18 = int_to_ptr.hbm [resolvable:$true] %s466_s18 }
  0x3a   :  { %221 = vrot.lane.b32.xlu0 %v484_v0, %s872_s17  ;;  %217 = vst.msk [vmem:[#allocation2] sm:$0xff] %vm216_vm0, %v215_v1  ;;  %v522_v10 = vld [vmem:[%s1087_s5] sm:$0xff]  ;;  %v392_v47 = vld [vmem:[#allocation16] sm:$0xff]  ;;  %s879_s17 = smov 8  }
  0x3b   :  { %v346_v0 = vld [vmem:[%s1072_s13] sm:$0xff]  ;;  %s877_s13 = smov [#allocation22]  }
  0x3c   :  { %v444_v1 = vld [vmem:[#allocation19] sm:$0xff]  ;;  %s464_s4 = sshll.u32 %s877_s13, 4  ;;  %s465_s4 = int_to_ptr.vmem [resolvable:$true] %s464_s4 }
  0x3d   :  { %437 = vmatpush.bf16.msra.mxu3 %v526_v46 }
  0x3e   :  { %302 = vperm.xlu1 %550, %v299_v5   ;;  %v525_v41 = vld [vmem:[%s1088_s10 + $0x8] sm:$0xff]  ;;  %v524_v42 = vld [vmem:[%s1088_s10] sm:$0xff] }
  0x3f   :  { %384 = vmatpush.bf16.msra.mxu2 %v525_v41  ;;  %v447_v5 = vld [vmem:[#allocation21] sm:$0xff] }
  0x42   :  { %244 = vperm.xlu0 %549, %v240_v3   ;;  %v351_v3 = vld [vmem:[%s1073_s14] sm:$0xff] }
  0x43   :  { %385 = vmatpush.bf16.msra.mxu2 %v524_v42 }
  0xa8   :  { %v250_v17 = vpop.permute.xlu1 %249 }
  0xac   :  { %v222_v6 = vpop.permute.xlu0 %221 }
  0xad   :  { %225 = vst.msk [vmem:[#allocation2] sm:$0xff] %vm224_vm1, %v222_v6 }
  0xb0   :  { %v303_v27 = vpop.permute.xlu1 %302 }
  0xb4   :  { %v226_v7 = vld [vmem:[#allocation2] sm:$0xff]  ;;  %v245_v11 = vpop.permute.xlu0 %244 }
  0xb5   :  { %v239_v8 = vpack.c.bf16 %v226_v7, %v226_v7  ;;  %v231_v29 = vmul.f32 %v551_v25, %v226_v7 }
  0xb7   :  { %v263_v9 = vsel %vm261_vm2, %v239_v8, 0  ;;  %v236_v35 = vadd.f32 %v556_v32, %v231_v29 }
  0xb8   :  { %272 = vmatpush.bf16.msra.mxu0 %v263_v9 }
  0xbb   :  { %489 = vmatmul.msk.bf16.vlgmr.msra.gmra.mxu0 %vm257_vm3, %v522_v10 }
 0x138   :  { %v274_v12 = vpop.f32.mrf.mxu0 }
 0x139   :  { %v275_v13 = vadd.f32 %v274_v12, %v245_v11 }
 0x13b   :  { %v283_v15 = vmul.f32 %v552_v14, %v275_v13 }
 0x13d   :  { %v289_v21 = vadd.f32 %v553_v16, %v283_v15 }
 0x13f   :  { %vm291_vm4 = vcmp.ge.f32.partialorder %v289_v21, 2.0 }
 0x140   :  { %v276_v18 = vpop.f32.mrf.mxu0 }
 0x141   :  { %v277_v19 = vadd.f32 %v276_v18, %v250_v17 }
 0x143   :  { %v284_v20 = vmul.f32 %v552_v14, %v277_v19 }
 0x145   :  { %v290_v22 = vadd.f32 %v553_v16, %v284_v20 }
 0x147   :  { %vm292_vm5 = vcmp.ge.f32.partialorder %v290_v22, 2.0 }
 0x148   :  { %vm492_vm6 = vmpackc.low %vm292_vm5, %vm291_vm4 }
 0x149   :  { %493 = vmatpush.bf16.msk.msra.mxu1 %vm492_vm6, %v874_v23 }
 0x14c   :  { %494 = vmatmul.msk.bf16.vlgmr.msra.gmra.mxu1 %vm305_vm7, %v298_v24 }
 0x1c9   :  { %v318_v28 = vpop.f32.mrf.mxu1 }
 0x1ca   :  { %v319_v30 = vadd.f32 %v318_v28, %v303_v27 }
 0x1cc   :  { %v326_v33 = vmul.f32 %v554_v26, %v319_v30 }
 0x1ce   :  { %v331_v34 = vadd.f32 %v555_v31, %v326_v33 }
 0x1d0   :  { %v332_v36 = vadd.f32 %v331_v34, %v236_v35 }
 0x1d1   :  { %v320_v37 = vpop.f32.mrf.mxu1 }
 0x1d2   :  { %vm333_vm8 = vcmp.ge.f32.partialorder %v332_v36, 2.0 }
 0x1d3   :  { %v495_v39 = vsel %vm333_vm8, 1.0, %v875_v38 }
 0x1d4   :  { %v336_v40 = vpack.c.bf16 %v495_v39, %v495_v39 }
 0x1d6   :  { %340 = vrot.lane.b32.xlu2 %v336_v40, %s876_s25  ;;  %338 = vst.msk [vmem:[#allocation3] sm:$0xf] %vm337_vm9, %v336_v40 }
 0x230   :  { %v341_v43 = vpop.permute.xlu2 %340 }
 0x231   :  { %343 = vst.msk [vmem:[#allocation3 + $0x4] sm:$0xf] %vm337_vm9, %v341_v43 }
 0x238   :  { %v523_v44 = vld [vmem:[#allocation3] sm:$0xff] }
 0x239   :  { %508 = vmatmul.msk.bf16.vlgmr.msra.gmra.mxu2 %vm216_vm0, %v523_v44  ;;  %v344_v62 = vld [vmem:[#allocation3] sm:$0xff]  }
 0x23a   :  { %v347_v63 = vunpack.c.l.bf16 %v344_v62  ;;  %v348_v9 = vunpack.c.h.bf16 %v344_v62 }
 0x23c   :  { %v349_v2 = vmul.f32 %v347_v63, %v346_v0  ;;  %v350_v11 = vmul.f32 %v348_v9, %v346_v0 }
 0x23e   :  { %v352_v7 = vadd.f32 %v351_v3, %v349_v2  ;;  %v353_v15 = vadd.f32 %v351_v3, %v350_v11 }
 0x2bc   :  { %v387_v48 = vpop.f32.mrf.mxu2 }
 0x2bd   :  { %v393_v50 = vmul.f32 %v392_v47, %v387_v48 }
 0x2bf   :  { %v396_v51 = vadd.f32 %v395_v49, %v393_v50 }
 0x2c1   :  { %vm398_vm10 = vcmp.ge.f32.partialorder %v396_v51, 2.0 }
 0x2c2   :  { %v509_v54 = vsel %vm398_vm10, 1.0, %v875_v38 }
 0x2c3   :  { %v404_v56 = vpack.c.bf16 %v509_v54, %v509_v54 }
 0x2c4   :  { %v389_v52 = vpop.f32.mrf.mxu2 }
 0x2c5   :  { %v394_v53 = vmul.f32 %v392_v47, %v389_v52  ;;  %v412_v59 = vunpack.c.l.b16 %v404_v56 }
 0x2c7   :  { %v397_v55 = vadd.f32 %v395_v49, %v394_v53 }
 0x2c9   :  { %vm399_vm11 = vcmp.ge.f32.partialorder %v397_v55, 2.0 }
 0x2ca   :  { %v510_v57 = vsel %vm399_vm11, 1.0, %v875_v38 }
 0x2cb   :  { %v405_v58 = vpack.c.bf16 %v510_v57, %v510_v57 }
 0x2cd   :  { %v413_v60 = vunpack.c.l.b16 %v405_v58 }
 0x2cf   :  { %v414_v61 = vpack.c.b16 %v413_v60, %v412_v59 }
 0x2d1   :  { %519 = vmatmul.msk.bf16.vlgmr.msra.gmra.mxu3 %vm216_vm0, %v414_v61 }
 0x354   :  { %v439_v4 = vpop.f32.mrf.mxu3 }
 0x355   :  { %v445_v6 = vmul.f32 %v444_v1, %v439_v4 }
 0x357   :  { %v448_v8 = vadd.f32 %v447_v5, %v445_v6 }
 0x359   :  { %v450_v10 = vadd.f32 %v448_v8, %v352_v7 }
 0x35b   :  { %vm452_vm12 = vcmp.ge.f32.partialorder %v450_v10, 2.0 }
 0x35c   :  { %v520_v12 = vsel %vm452_vm12, 1.0, %v875_v38  ;;  %v441_v13 = vpop.f32.mrf.mxu3 }
 0x35d   :  { %458 = vst.msk [vmem:[#allocation22] sm:$0xff] %vm216_vm0, %v520_v12  ;;  %v446_v14 = vmul.f32 %v444_v1, %v441_v13 }
 0x35f   :  { %v449_v16 = vadd.f32 %v447_v5, %v446_v14 }
 0x361   :  { %v451_v17 = vadd.f32 %v449_v16, %v353_v15 }
 0x363   :  { %vm453_vm13 = vcmp.ge.f32.partialorder %v451_v17, 2.0 }
 0x364   :  { %v521_v18 = vsel %vm453_vm13, 1.0, %v875_v38 }
 0x365   :  { %459 = vst.msk [vmem:[#allocation22 + $0x8] sm:$0xff] %vm216_vm0, %v521_v18 }
 0x366   :  { %472 = dma.vmem_to_hbm [thread:$0]  %s465_s4, 256, %s467_s18, [#allocation6], %s878_s0, %s878_s0, %s879_s17  }
 0x367   :  { %857 = dma.done.wait [#allocation6], 256  }
 0x368   :  { %858 = vsyncadd [#allocation6], 4294967040 }
 0x369   :  { %477 = vsyncpa [#allocation5], 1 }
 0x36a   :  { %478 = vsyncpa [#allocation8], 1 }
 0x36b   :  { %479 = vsyncpa [#allocation11], 1 }
 0x36c   :  { %480 = vsyncpa [#allocation14], 1 }
 0x36d   :  { %481 = vsyncpa [#allocation17], 1 }
 0x36e   :  { %482 = vsyncpa [#allocation20], 1 }
 0x36f   :  { %483 = vsyncpa [#allocation6], 1 }

// kernel: tpu_custom_call.1
= control target key start
LH: loop header
LB: loop body
LE: loop exit
PB: predicated region body
PF: predicated region fallthrough
CT: control target
= control target key end

     0   :  { %s1059_s0 = inlined_call_operand.vmem [shape: f32[2,8,32], index: 0, kind: input, shape index: {}]   ;;  %s1060_s1 = inlined_call_operand.vmem [shape: bf16[16,8], index: 1, kind: input, shape index: {}]   ;;  %s1061_s2 = inlined_call_operand.hbm [shape: bf16[8,16], index: 2, kind: input, shape index: {}]   ;;  %s1062_s3 = inlined_call_operand.vmem [shape: bf16[32,32], index: 3, kind: input, shape index: {}]   ;;  %s1063_s4 = inlined_call_operand.hbm [shape: bf16[32,32], index: 4, kind: input, shape index: {}]   ;;  %s1064_s5 = inlined_call_operand.vmem [shape: f32[16,1], index: 5, kind: input, shape index: {}]   ;;  %s1065_s6 = inlined_call_operand.vmem [shape: f32[8,1], index: 6, kind: input, shape index: {}]   ;;  %s1066_s7 = inlined_call_operand.vmem [shape: f32[1,64], index: 7, kind: input, shape index: {}]   ;;  %s1067_s8 = inlined_call_operand.hbm [shape: f32[1,64], index: 8, kind: input, shape index: {}]   ;;  %s1068_s9 = inlined_call_operand.hbm [shape: f32[1,64], index: 9, kind: input, shape index: {}]   ;;  %s1069_s10 = inlined_call_operand.hbm [shape: f32[1,64], index: 10, kind: input, shape index: {}]   ;;  %s1070_s11 = inlined_call_operand.hbm [shape: f32[1,64], index: 11, kind: input, shape index: {}]   ;;  %s1071_s12 = inlined_call_operand.hbm [shape: f32[1,64], index: 12, kind: input, shape index: {}]   ;;  %s1072_s13 = inlined_call_operand.vmem [shape: f32[8,32], index: 13, kind: input, shape index: {}]   ;;  %s1073_s14 = inlined_call_operand.vmem [shape: f32[8,32], index: 14, kind: input, shape index: {}]   ;;  %s1074_s15 = inlined_call_operand.hbm [shape: f32[8,32], index: 15, kind: input, shape index: {}]   ;;  %s1075_s16 = inlined_call_operand.hbm [shape: f32[8,32], index: 16, kind: input, shape index: {}]   ;;  %s1076_s17 = inlined_call_operand.hbm [shape: f32[8,32], index: 17, kind: input, shape index: {}]   ;;  %s1077_s18 = inlined_call_operand.hbm [shape: f32[8,32], index: 18, kind: input, shape index: {}]   ;;  %s1078_s19 = inlined_call_operand.hbm [shape: f32[2,8,32], index: 19, kind: output, shape index: {}]  }
   0x1   :  { %1081 = sst [smem:[#allocation30_spill]] %s1059_s0 }
   0x2   :  { %1082 = sst [smem:[#allocation31_spill]] %s1060_s1 }
   0x3   :  { %1083 = sst [smem:[#allocation32_spill]] %s1061_s2 }
   0x4   :  { %1084 = sst [smem:[#allocation33_spill]] %s1062_s3 }
   0x5   :  { %24 = vsyncpa [#allocation5], 0 }
   0x6   :  { %25 = vsyncpa [#allocation8], 0 }
   0x7   :  { %26 = vsyncpa [#allocation11], 0 }
   0x8   :  { %27 = vsyncpa [#allocation14], 0 }
   0x9   :  { %28 = vsyncpa [#allocation17], 0 }
   0xa   :  { %29 = vsyncpa [#allocation20], 0  ;;  %s52_s20 = sshll.u32 %s1063_s4, 4  ;;  %s53_s20 = int_to_ptr.hbm [resolvable:$true] %s52_s20 }
   0xb   :  { %30 = vsyncpa [#allocation6], 0  ;;  %s859_s21 = smov [#allocation7]   ;;  %s83_s23 = sshll.u32 %s1068_s9, 4  ;;  %s84_s23 = int_to_ptr.hbm [resolvable:$true] %s83_s23 }
   0xc   :  { %s54_s1 = sshll.u32 %s859_s21, 4  ;;  %s860_s24 = smov 64   ;;  %s55_s1 = int_to_ptr.vmem [resolvable:$true] %s54_s1 }
   0xd   :  { %s861_s25 = smov 4   ;;  %s862_s3 = smov [#allocation10]  }
   0xe   :  { %60 = dma.hbm_to_vmem [thread:$0]  %s53_s20, 256, %s55_s1, [#allocation8], %s860_s24, %s860_s24, %s861_s25  }
   0xf   :  { %s85_s26 = sshll.u32 %s862_s3, 4  ;;  %s105_s29 = sshll.u32 %s1070_s11, 4  ;;  %s86_s26 = int_to_ptr.vmem [resolvable:$true] %s85_s26  ;;  %s106_s29 = int_to_ptr.hbm [resolvable:$true] %s105_s29 }
  0x10   :  { %88 = dma.hbm_to_vmem [thread:$0]  %s84_s23, 16, %s86_s26, [#allocation11]  }
  0x11   :  { %s131_s30 = sshll.u32 %s1074_s15, 4  ;;  %s863_s21 = smov [#allocation13]   ;;  %s132_s30 = int_to_ptr.hbm [resolvable:$true] %s131_s30 }
  0x12   :  { %s107_s22 = sshll.u32 %s863_s21, 4  ;;  %s864_s9 = smov [#allocation16]   ;;  %s108_s22 = int_to_ptr.vmem [resolvable:$true] %s107_s22 }
  0x13   :  { %110 = dma.hbm_to_vmem [thread:$0]  %s106_s29, 16, %s108_s22, [#allocation14]  }
  0x14   :  { %s133_s20 = sshll.u32 %s864_s9, 4  ;;  %s153_s24 = sshll.u32 %s1076_s17, 4  ;;  %s134_s20 = int_to_ptr.vmem [resolvable:$true] %s133_s20  ;;  %s154_s24 = int_to_ptr.hbm [resolvable:$true] %s153_s24 }
  0x15   :  { %136 = dma.hbm_to_vmem [thread:$0]  %s132_s30, 128, %s134_s20, [#allocation17]  }
  0x16   :  { %s1085_s25 = sld [smem:[#allocation32_spill]]  ;;  %s865_s26 = smov [#allocation19]  }
  0x17   :  { %s155_s15 = sshll.u32 %s865_s26, 4  ;;  %s866_s27 = smov [#allocation4]   ;;  %s156_s15 = int_to_ptr.vmem [resolvable:$true] %s155_s15 }
  0x18   :  { %158 = dma.hbm_to_vmem [thread:$0]  %s154_s24, 128, %s156_s15, [#allocation20]  }
  0x19   :  { %s42_s28 = sshll.u32 %s866_s27, 4  ;;  %s72_s0 = sshll.u32 %s1067_s8, 4  ;;  %s43_s28 = int_to_ptr.vmem [resolvable:$true] %s42_s28  ;;  %s73_s0 = int_to_ptr.hbm [resolvable:$true] %s72_s0 }
  0x1a   :  { %s94_s21 = sshll.u32 %s1069_s10, 4  ;;  %s867_s22 = smov [#allocation9]   ;;  %s95_s21 = int_to_ptr.hbm [resolvable:$true] %s94_s21 }
  0x1b   :  { %s74_s9 = sshll.u32 %s867_s22, 4  ;;  %s868_s20 = smov [#allocation12]   ;;  %s75_s9 = int_to_ptr.vmem [resolvable:$true] %s74_s9 }
  0x1c   :  { %s40_s3 = sshll.u32 %s1085_s25, 4  ;;  %s96_s1 = sshll.u32 %s868_s20, 4  ;;  %s41_s3 = int_to_ptr.hbm [resolvable:$true] %s40_s3  ;;  %s97_s1 = int_to_ptr.vmem [resolvable:$true] %s96_s1 }
  0x1d   :  { %45 = dma.hbm_to_vmem [thread:$0]  %s41_s3, 64, %s43_s28, [#allocation5]  }
  0x1e   :  { %77 = dma.hbm_to_vmem [thread:$0]  %s73_s0, 16, %s75_s9, [#allocation8]  }
  0x1f   :  { %s116_s11 = sshll.u32 %s1071_s12, 4  ;;  %s142_s25 = sshll.u32 %s1075_s16, 4  ;;  %s117_s11 = int_to_ptr.hbm [resolvable:$true] %s116_s11  ;;  %s143_s25 = int_to_ptr.hbm [resolvable:$true] %s142_s25 }
  0x20   :  { %99 = dma.hbm_to_vmem [thread:$0]  %s95_s21, 16, %s97_s1, [#allocation11]  }
  0x21   :  { %s869_s3 = smov [#allocation15]   ;;  %s870_s26 = smov [#allocation18]  }
  0x22   :  { %s118_s10 = sshll.u32 %s869_s3, 4  ;;  %s144_s15 = sshll.u32 %s870_s26, 4  ;;  %s119_s10 = int_to_ptr.vmem [resolvable:$true] %s118_s10  ;;  %s145_s15 = int_to_ptr.vmem [resolvable:$true] %s144_s15 }
  0x23   :  { %121 = dma.hbm_to_vmem [thread:$0]  %s117_s11, 16, %s119_s10, [#allocation14]  }
  0x24   :  { %s164_s29 = sshll.u32 %s1077_s18, 4  ;;  %s871_s12 = smov [#allocation21]   ;;  %s165_s29 = int_to_ptr.hbm [resolvable:$true] %s164_s29 }
  0x25   :  { %147 = dma.hbm_to_vmem [thread:$0]  %s143_s25, 128, %s145_s15, [#allocation17]  }
  0x26   :  { %s166_s4 = sshll.u32 %s871_s12, 4  ;;  %s167_s4 = int_to_ptr.vmem [resolvable:$true] %s166_s4 }
  0x27   :  { %169 = dma.hbm_to_vmem [thread:$0]  %s165_s29, 128, %s167_s4, [#allocation20]  }
  0x28   :  { %845 = dma.done.wait [#allocation5], 64  }
  0x29   :  { %846 = vsyncadd [#allocation5], 4294967232 }
  0x2a   :  { %847 = dma.done.wait [#allocation8], 272  }
  0x2b   :  { %848 = vsyncadd [#allocation8], 4294967024 }
  0x2c   :  { %849 = dma.done.wait [#allocation11], 32  }
  0x2d   :  { %850 = vsyncadd [#allocation11], 4294967264 }
  0x2e   :  { %851 = dma.done.wait [#allocation14], 32  }
  0x2f   :  { %852 = vsyncadd [#allocation14], 4294967264 }
  0x30   :  { %853 = dma.done.wait [#allocation17], 256  }
  0x31   :  { %854 = vsyncadd [#allocation17], 4294967040 }
  0x32   :  { %855 = dma.done.wait [#allocation20], 256  }
  0x33   :  { %856 = vsyncadd [#allocation20], 4294967040  ;;  %s1086_s0 = sld [smem:[#allocation30_spill]]  ;;  %s872_s17 = smov 32   ;;  %vm216_vm0 = vcmask 261120   ;;  %v241_v2 = vld [vmem:[%s1064_s5 + $0x8] sm:$0xff] }
  0x34   :  { %v240_v3 = vld [vmem:[%s1064_s5] sm:$0xff]  ;;  %v873_v4 = vmov 0   ;;  %vm224_vm1 = vcmask 523520   ;;  %vm261_vm2 = vcmask 1043456   ;;  %s1087_s5 = sld [smem:[#allocation31_spill]]  ;;  %vm257_vm3 = vcmask 64512  }
  0x35   :  { %550 = vset.pattern.permute.xlu1 %v873_v4  ;;  %549 = vset.pattern.permute.xlu0 %v873_v4  ;;  %v299_v5 = vld [vmem:[%s1065_s6] sm:$0xff]  ;;  %v553_v16 = vld [vmem:[#allocation12] ss:$0 sm:$0xff]  ;;  %v874_v23 = vmov 1.0|1.0   ;;  %vm305_vm7 = vcmask 130048  }
  0x36   :  { %249 = vperm.xlu1 %550, %v241_v2   ;;  %v552_v14 = vld [vmem:[#allocation10] ss:$0 sm:$0xff]  ;;  %v298_v24 = vld [vmem:[#allocation4] sm:$0xf]  ;;  %v551_v25 = vld [vmem:[%s1066_s7] ss:$0 sm:$0xff] }
  0x37   :  { %v554_v26 = vld [vmem:[#allocation13] ss:$0 sm:$0xff]  ;;  %v555_v31 = vld [vmem:[#allocation15] ss:$0 sm:$0xff]  ;;  %v556_v32 = vld [vmem:[#allocation9] ss:$0 sm:$0xff] }
  0x38   :  { %v875_v38 = vmov 0.0   ;;  %vm337_vm9 = vcmask 257024   ;;  %s876_s25 = smov 96   ;;  %s1088_s10 = sld [smem:[#allocation33_spill]]  ;;  %v527_v45 = vld [vmem:[#allocation7 + $0x8] sm:$0xff]  ;;  %v526_v46 = vld [vmem:[#allocation7] sm:$0xff] }
  0x39   :  { %v484_v0 = vld [vmem:[%s1086_s0 + $0x8] sm:$0xff]  ;;  %v215_v1 = vld [vmem:[%s1086_s0] sm:$0xff]  ;;  %436 = vmatpush.bf16.msra.mxu3 %v527_v45  ;;  %v395_v49 = vld [vmem:[#allocation18] sm:$0xff]  ;;  %s466_s18 = sshll.u32 %s1078_s19, 4  ;;  %s878_s0 = smov 128   ;;  %s467_s18 = int_to_ptr.hbm [resolvable:$true] %s466_s18 }
  0x3a   :  { %221 = vrot.lane.b32.xlu0 %v484_v0, %s872_s17  ;;  %217 = vst.msk [vmem:[#allocation2] sm:$0xff] %vm216_vm0, %v215_v1  ;;  %v522_v10 = vld [vmem:[%s1087_s5] sm:$0xff]  ;;  %v392_v47 = vld [vmem:[#allocation16] sm:$0xff]  ;;  %s879_s17 = smov 8  }
  0x3b   :  { %v346_v0 = vld [vmem:[%s1072_s13] sm:$0xff]  ;;  %s877_s13 = smov [#allocation22]  }
  0x3c   :  { %v444_v1 = vld [vmem:[#allocation19] sm:$0xff]  ;;  %s464_s4 = sshll.u32 %s877_s13, 4  ;;  %s465_s4 = int_to_ptr.vmem [resolvable:$true] %s464_s4 }
  0x3d   :  { %437 = vmatpush.bf16.msra.mxu3 %v526_v46 }
  0x3e   :  { %302 = vperm.xlu1 %550, %v299_v5   ;;  %v525_v41 = vld [vmem:[%s1088_s10 + $0x8] sm:$0xff]  ;;  %v524_v42 = vld [vmem:[%s1088_s10] sm:$0xff] }
  0x3f   :  { %384 = vmatpush.bf16.msra.mxu2 %v525_v41  ;;  %v447_v5 = vld [vmem:[#allocation21] sm:$0xff] }
  0x42   :  { %244 = vperm.xlu0 %549, %v240_v3   ;;  %v351_v3 = vld [vmem:[%s1073_s14] sm:$0xff] }
  0x43   :  { %385 = vmatpush.bf16.msra.mxu2 %v524_v42 }
  0xa8   :  { %v250_v17 = vpop.permute.xlu1 %249 }
  0xac   :  { %v222_v6 = vpop.permute.xlu0 %221 }
  0xad   :  { %225 = vst.msk [vmem:[#allocation2] sm:$0xff] %vm224_vm1, %v222_v6 }
  0xb0   :  { %v303_v27 = vpop.permute.xlu1 %302 }
  0xb4   :  { %v226_v7 = vld [vmem:[#allocation2] sm:$0xff]  ;;  %v245_v11 = vpop.permute.xlu0 %244 }
  0xb5   :  { %v239_v8 = vpack.c.bf16 %v226_v7, %v226_v7  ;;  %v231_v29 = vmul.f32 %v551_v25, %v226_v7 }
  0xb7   :  { %v263_v9 = vsel %vm261_vm2, %v239_v8, 0  ;;  %v236_v35 = vadd.f32 %v556_v32, %v231_v29 }
  0xb8   :  { %272 = vmatpush.bf16.msra.mxu0 %v263_v9 }
  0xbb   :  { %489 = vmatmul.msk.bf16.vlgmr.msra.gmra.mxu0 %vm257_vm3, %v522_v10 }
 0x138   :  { %v274_v12 = vpop.f32.mrf.mxu0 }
 0x139   :  { %v275_v13 = vadd.f32 %v274_v12, %v245_v11 }
 0x13b   :  { %v283_v15 = vmul.f32 %v552_v14, %v275_v13 }
 0x13d   :  { %v289_v21 = vadd.f32 %v553_v16, %v283_v15 }
 0x13f   :  { %vm291_vm4 = vcmp.ge.f32.partialorder %v289_v21, 2.0 }
 0x140   :  { %v276_v18 = vpop.f32.mrf.mxu0 }
 0x141   :  { %v277_v19 = vadd.f32 %v276_v18, %v250_v17 }
 0x143   :  { %v284_v20 = vmul.f32 %v552_v14, %v277_v19 }
 0x145   :  { %v290_v22 = vadd.f32 %v553_v16, %v284_v20 }
 0x147   :  { %vm292_vm5 = vcmp.ge.f32.partialorder %v290_v22, 2.0 }
 0x148   :  { %vm492_vm6 = vmpackc.low %vm292_vm5, %vm291_vm4 }
 0x149   :  { %493 = vmatpush.bf16.msk.msra.mxu1 %vm492_vm6, %v874_v23 }
 0x14c   :  { %494 = vmatmul.msk.bf16.vlgmr.msra.gmra.mxu1 %vm305_vm7, %v298_v24 }
 0x1c9   :  { %v318_v28 = vpop.f32.mrf.mxu1 }
 0x1ca   :  { %v319_v30 = vadd.f32 %v318_v28, %v303_v27 }
 0x1cc   :  { %v326_v33 = vmul.f32 %v554_v26, %v319_v30 }
 0x1ce   :  { %v331_v34 = vadd.f32 %v555_v31, %v326_v33 }
 0x1d0   :  { %v332_v36 = vadd.f32 %v331_v34, %v236_v35 }
 0x1d1   :  { %v320_v37 = vpop.f32.mrf.mxu1 }
 0x1d2   :  { %vm333_vm8 = vcmp.ge.f32.partialorder %v332_v36, 2.0 }
 0x1d3   :  { %v495_v39 = vsel %vm333_vm8, 1.0, %v875_v38 }
 0x1d4   :  { %v336_v40 = vpack.c.bf16 %v495_v39, %v495_v39 }
 0x1d6   :  { %340 = vrot.lane.b32.xlu2 %v336_v40, %s876_s25  ;;  %338 = vst.msk [vmem:[#allocation3] sm:$0xf] %vm337_vm9, %v336_v40 }
 0x230   :  { %v341_v43 = vpop.permute.xlu2 %340 }
 0x231   :  { %343 = vst.msk [vmem:[#allocation3 + $0x4] sm:$0xf] %vm337_vm9, %v341_v43 }
 0x238   :  { %v523_v44 = vld [vmem:[#allocation3] sm:$0xff] }
 0x239   :  { %508 = vmatmul.msk.bf16.vlgmr.msra.gmra.mxu2 %vm216_vm0, %v523_v44  ;;  %v344_v62 = vld [vmem:[#allocation3] sm:$0xff]  }
 0x23a   :  { %v347_v63 = vunpack.c.l.bf16 %v344_v62  ;;  %v348_v9 = vunpack.c.h.bf16 %v344_v62 }
 0x23c   :  { %v349_v2 = vmul.f32 %v347_v63, %v346_v0  ;;  %v350_v11 = vmul.f32 %v348_v9, %v346_v0 }
 0x23e   :  { %v352_v7 = vadd.f32 %v351_v3, %v349_v2  ;;  %v353_v15 = vadd.f32 %v351_v3, %v350_v11 }
 0x2bc   :  { %v387_v48 = vpop.f32.mrf.mxu2 }
 0x2bd   :  { %v393_v50 = vmul.f32 %v392_v47, %v387_v48 }
 0x2bf   :  { %v396_v51 = vadd.f32 %v395_v49, %v393_v50 }
 0x2c1   :  { %vm398_vm10 = vcmp.ge.f32.partialorder %v396_v51, 2.0 }
 0x2c2   :  { %v509_v54 = vsel %vm398_vm10, 1.0, %v875_v38 }
 0x2c3   :  { %v404_v56 = vpack.c.bf16 %v509_v54, %v509_v54 }
 0x2c4   :  { %v389_v52 = vpop.f32.mrf.mxu2 }
 0x2c5   :  { %v394_v53 = vmul.f32 %v392_v47, %v389_v52  ;;  %v412_v59 = vunpack.c.l.b16 %v404_v56 }
 0x2c7   :  { %v397_v55 = vadd.f32 %v395_v49, %v394_v53 }
 0x2c9   :  { %vm399_vm11 = vcmp.ge.f32.partialorder %v397_v55, 2.0 }
 0x2ca   :  { %v510_v57 = vsel %vm399_vm11, 1.0, %v875_v38 }
 0x2cb   :  { %v405_v58 = vpack.c.bf16 %v510_v57, %v510_v57 }
 0x2cd   :  { %v413_v60 = vunpack.c.l.b16 %v405_v58 }
 0x2cf   :  { %v414_v61 = vpack.c.b16 %v413_v60, %v412_v59 }
 0x2d1   :  { %519 = vmatmul.msk.bf16.vlgmr.msra.gmra.mxu3 %vm216_vm0, %v414_v61 }
 0x354   :  { %v439_v4 = vpop.f32.mrf.mxu3 }
 0x355   :  { %v445_v6 = vmul.f32 %v444_v1, %v439_v4 }
 0x357   :  { %v448_v8 = vadd.f32 %v447_v5, %v445_v6 }
 0x359   :  { %v450_v10 = vadd.f32 %v448_v8, %v352_v7 }
 0x35b   :  { %vm452_vm12 = vcmp.ge.f32.partialorder %v450_v10, 2.0 }
 0x35c   :  { %v520_v12 = vsel %vm452_vm12, 1.0, %v875_v38  ;;  %v441_v13 = vpop.f32.mrf.mxu3 }
 0x35d   :  { %458 = vst.msk [vmem:[#allocation22] sm:$0xff] %vm216_vm0, %v520_v12  ;;  %v446_v14 = vmul.f32 %v444_v1, %v441_v13 }
 0x35f   :  { %v449_v16 = vadd.f32 %v447_v5, %v446_v14 }
 0x361   :  { %v451_v17 = vadd.f32 %v449_v16, %v353_v15 }
 0x363   :  { %vm453_vm13 = vcmp.ge.f32.partialorder %v451_v17, 2.0 }
 0x364   :  { %v521_v18 = vsel %vm453_vm13, 1.0, %v875_v38 }
 0x365   :  { %459 = vst.msk [vmem:[#allocation22 + $0x8] sm:$0xff] %vm216_vm0, %v521_v18 }
 0x366   :  { %472 = dma.vmem_to_hbm [thread:$0]  %s465_s4, 256, %s467_s18, [#allocation6], %s878_s0, %s878_s0, %s879_s17  }
 0x367   :  { %857 = dma.done.wait [#allocation6], 256  }
 0x368   :  { %858 = vsyncadd [#allocation6], 4294967040 }
 0x369   :  { %477 = vsyncpa [#allocation5], 1 }
 0x36a   :  { %478 = vsyncpa [#allocation8], 1 }
 0x36b   :  { %479 = vsyncpa [#allocation11], 1 }
 0x36c   :  { %480 = vsyncpa [#allocation14], 1 }
 0x36d   :  { %481 = vsyncpa [#allocation17], 1 }
 0x36e   :  { %482 = vsyncpa [#allocation20], 1 }
 0x36f   :  { %483 = vsyncpa [#allocation6], 1 }

</bundles_post_ra>
